<compile_context>
chip_gen: v5e
topology: v5e:2x2
jax: 0.10.0
libtpu: 0.0.40
codegen_flags: <defaults>
</compile_context>

<pallas_src>
import jax
import jax.numpy as jnp
from jax.experimental import pallas as pl
from jax.experimental.pallas import tpu as pltpu


def ensemble_mlp_kernel(x_ref, w1_ref, b1_ref, w2_ref, b2_ref, w3_ref, b3_ref, o_ref):
    """One particle block.

    x_ref : (B, d_in)                        resident across grid steps
    w1_ref: (1, d_in, Pb*H)     b1_ref: (1, 1, Pb*H)      (biases always f32)
    w2_ref: (1, NG, g*H, g*H)   b2_ref: (1, NG, 1, g*H)   block-diagonal group tiles
    w3_ref: (1, NG, g*H, g*dO)  b3_ref: (1, NG, 1, g*dO)
    o_ref : (1, B, Pb*dO)                    lane-dense output tile
    """
    _, ng, gh, gdo = w3_ref.shape

    x = x_ref[...]

    # Layer 1, fused across the whole particle block: one wide MXU matmul (N = Pb*H).
    h1 = jnp.dot(x, w1_ref[0], preferred_element_type=jnp.float32)        # (B, Pb*H) f32
    h1 = jnp.maximum(h1 + b1_ref[0], 0.0).astype(w2_ref.dtype)

    # Layers 2/3, fused per lane-aligned particle group via block-diagonal weight tiles.
    for grp in range(ng):
        h1g = h1[:, grp * gh:(grp + 1) * gh]                               # (B, g*H)
        h2g = jnp.dot(h1g, w2_ref[0, grp], preferred_element_type=jnp.float32)
        h2g = jnp.maximum(h2g + b2_ref[0, grp], 0.0).astype(w3_ref.dtype)  # (B, g*H)
        yg = jnp.dot(h2g, w3_ref[0, grp], preferred_element_type=jnp.float32)
        yg = yg + b3_ref[0, grp]                                           # (B, g*dO) f32
        # Direct store into the output tile slice (VMEM-only partial store); the HBM
        # writeback of the full (B, Pb*dO) tile remains lane-dense.
        o_ref[0, :, grp * gdo:(grp + 1) * gdo] = yg.astype(o_ref.dtype)


# ----------------------------- generation-aware sizing helpers -----------------------------

def _num_tensorcores():
    """TensorCores sharing the grid under dimension_semantics=('parallel',)."""
    try:
        kind = jax.devices()[0].device_kind.lower()
    except Exception:
        return 1
    # v7x has 2 TCs/chip; v4/v5p megacore also split 'parallel' axes. v5e/v6e are single-TC.
    if any(tag in kind for tag in ("7x", "v7", "v4", "v5p")):
        return 2
    return 1


def _scoped_vmem_cap_bytes():
    """Generation-aware ceiling for vmem_limit_bytes (headroom below physical VMEM)."""
    try:
        phys = int(pltpu.get_tpu_info().vmem_capacity_bytes)
    except Exception:
        phys = 64 * 1024 * 1024  # conservative: v7x-sized VMEM
    return max(16 * 1024 * 1024, (phys * 3) // 4)


def _group_size(pb, hidden):
    """Largest divisor of pb with group fan-in g*H <= 128 (lane-aligned when H divides 128)."""
    g_target = max(1, 128 // hidden)
    g = 1
    for d in range(1, pb + 1):
        if pb % d == 0 and d <= g_target:
            g = d
    return g


def _block_vmem_bytes(pb, b, d_in, hidden, d_out, bpe):
    g = _group_size(pb, hidden)
    return (bpe * (b * d_in + d_in * pb * hidden           # x + W1 block
                   + pb * g * hidden * hidden              # block-diag W2 groups
                   + pb * g * hidden * d_out)              # block-diag W3 groups
            + 4 * (2 * pb * hidden + pb * d_out)           # f32 biases
            + 4 * b * pb * d_out)                          # output tile


def _choose_particle_block(num_particles, b, d_in, hidden, d_out, bpe, num_tc, vmem_cap):
    divisors = sorted((d for d in range(1, num_particles + 1) if num_particles % d == 0),
                      reverse=True)

    def fits(pb):
        # double-buffered block + ~2 MiB compiler scratch headroom
        return 2 * _block_vmem_bytes(pb, b, d_in, hidden, d_out, bpe) + (2 << 20) <= vmem_cap

    # Multi-TC chips: keep NB a positive multiple of the TC count so both cores get equal work.
    # Single-TC chips: take the largest fitting block (NB = 1 ideally).
    for pb in divisors:
        nb = num_particles // pb
        if num_tc > 1 and (nb < num_tc or nb % num_tc != 0):
            continue
        if fits(pb):
            return pb
    for pb in divisors:  # fallback: ignore the TC constraint
        if fits(pb):
            return pb
    return 1


# --------------------------------------- wrapper ---------------------------------------

def ensemble_forward(x, params, particle_block=None, compute_dtype=jnp.float32):
    """x: (B, d_in) f32. params: stacked per-particle (fan_in, fan_out) weights.

    Returns (P, B, d_out) f32. compute_dtype=jnp.bfloat16 halves weight/x HBM traffic and MXU
    pass count on all generations; accumulation and bias adds stay f32.
    """
    w1, b1, w2, b2, w3, b3 = (params["w1"], params["b1"], params["w2"],
                              params["b2"], params["w3"], params["b3"])
    P, d_in, H = w1.shape
    d_out = w3.shape[-1]
    B = x.shape[0]

    bpe = jnp.dtype(compute_dtype).itemsize
    num_tc = _num_tensorcores()
    vmem_cap = _scoped_vmem_cap_bytes()

    Pb = particle_block if particle_block is not None else _choose_particle_block(
        P, B, d_in, H, d_out, bpe, num_tc, vmem_cap)
    assert P % Pb == 0, (P, Pb)
    NB = P // Pb
    g = _group_size(Pb, H)
    NG = Pb // g

    # ---- Wrapper-side layout plumbing (pure XLA, outside the kernel) ----
    # Layer 1: per-block weights concatenated along fan_out -> (d_in, Pb*H), particle-major.
    w1c = w1.reshape(NB, Pb, d_in, H).transpose(0, 2, 1, 3).reshape(NB, d_in, Pb * H)
    b1c = b1.reshape(NB, 1, Pb * H).astype(jnp.float32)
    # Layers 2/3: block-diagonal group tiles (g*H, g*H) / (g*H, g*d_out).
    eye_g = jnp.eye(g, dtype=w2.dtype)
    w2g = jnp.einsum("ij,pqiab->pqiajb",
                     eye_g, w2.reshape(NB, NG, g, H, H)).reshape(NB, NG, g * H, g * H)
    w3g = jnp.einsum("ij,pqiab->pqiajb",
                     eye_g, w3.reshape(NB, NG, g, H, d_out)).reshape(NB, NG, g * H, g * d_out)
    b2g = b2.reshape(NB, NG, 1, g * H).astype(jnp.float32)
    b3g = b3.reshape(NB, NG, 1, g * d_out).astype(jnp.float32)

    xc = x.astype(compute_dtype)
    w1c = w1c.astype(compute_dtype)
    w2g = w2g.astype(compute_dtype)
    w3g = w3g.astype(compute_dtype)

    # Scheduler hint + VMEM budget.
    flops = 2 * P * B * (d_in * H + H * H + H * d_out)
    bytes_accessed = int(bpe * (xc.size + w1c.size + w2g.size + w3g.size)
                         + 4 * (b1c.size + b2g.size + b3g.size + P * B * d_out))
    block_bytes = _block_vmem_bytes(Pb, B, d_in, H, d_out, bpe)
    vmem_limit = int(min(vmem_cap, max(8 * 1024 * 1024, 4 * block_bytes)))

    grid_spec = pltpu.PrefetchScalarGridSpec(
        num_scalar_prefetch=0,
        grid=(NB,),
        in_specs=[
            pl.BlockSpec((B, d_in), lambda nb: (0, 0)),                          # x (resident)
            pl.BlockSpec((1, d_in, Pb * H), lambda nb: (nb, 0, 0)),              # W1 block
            pl.BlockSpec((1, 1, Pb * H), lambda nb: (nb, 0, 0)),                 # b1 block
            pl.BlockSpec((1, NG, g * H, g * H), lambda nb: (nb, 0, 0, 0)),       # W2 groups
            pl.BlockSpec((1, NG, 1, g * H), lambda nb: (nb, 0, 0, 0)),           # b2 groups
            pl.BlockSpec((1, NG, g * H, g * d_out), lambda nb: (nb, 0, 0, 0)),   # W3 groups
            pl.BlockSpec((1, NG, 1, g * d_out), lambda nb: (nb, 0, 0, 0)),       # b3 groups
        ],
        out_specs=pl.BlockSpec((1, B, Pb * d_out), lambda nb: (nb, 0, 0)),
    )

    out = pl.pallas_call(
        ensemble_mlp_kernel,
        out_shape=jax.ShapeDtypeStruct((NB, B, Pb * d_out), jnp.float32),
        grid_spec=grid_spec,
        compiler_params=pltpu.CompilerParams(
            dimension_semantics=("parallel",),
            vmem_limit_bytes=vmem_limit),
        cost_estimate=pl.CostEstimate(flops=flops, transcendentals=0,
                                      bytes_accessed=bytes_accessed),
    )(xc, w1c, b1c, w2g, b2g, w3g, b3g)

    # (NB, B, Pb*d_out) -> (P, B, d_out); particles are packed particle-major in the lane dim.
    return out.reshape(NB, B, Pb, d_out).transpose(0, 2, 1, 3).reshape(P, B, d_out)


def init_ensemble_params(key, num_particles, input_size, hidden_size, output_size):
    ks = jax.random.split(key, 6)
    scale = 0.1
    return {
        "w1": scale * jax.random.normal(ks[0], (num_particles, input_size, hidden_size), jnp.float32),
        "b1": scale * jax.random.normal(ks[1], (num_particles, hidden_size), jnp.float32),
        "w2": scale * jax.random.normal(ks[2], (num_particles, hidden_size, hidden_size), jnp.float32),
        "b2": scale * jax.random.normal(ks[3], (num_particles, hidden_size), jnp.float32),
        "w3": scale * jax.random.normal(ks[4], (num_particles, hidden_size, output_size), jnp.float32),
        "b3": scale * jax.random.normal(ks[5], (num_particles, output_size), jnp.float32),
    }


def ensemble_forward_ref(x, params):
    """Pure-JAX reference mirroring the PyTorch forward."""
    def one_particle(w1, b1, w2, b2, w3, b3):
        h1 = jnp.maximum(x @ w1 + b1, 0.0)
        h2 = jnp.maximum(h1 @ w2 + b2, 0.0)
        return h2 @ w3 + b3
    return jax.vmap(one_particle)(params["w1"], params["b1"], params["w2"],
                                  params["b2"], params["w3"], params["b3"])


if __name__ == "__main__":
    # Small, forward-consistent shapes: H=32 -> particle groups of g=4 (g*H = 128 lanes).
    num_particles = 32
    batch = 8
    input_size = 16
    hidden_size = 32
    output_size = 8

    key = jax.random.PRNGKey(0)
    k_x, k_p = jax.random.split(key)

    x = jax.random.normal(k_x, (batch, input_size), jnp.float32)
    params = init_ensemble_params(k_p, num_particles, input_size, hidden_size, output_size)

    ref = ensemble_forward_ref(x, params)

    # f32 path: strict parity with the pure-JAX reference.
    out = jax.block_until_ready(ensemble_forward(x, params))
    assert out.shape == (num_particles, batch, output_size), out.shape
    assert jnp.allclose(out, ref, atol=1e-4, rtol=1e-4), "f32 mismatch vs reference"

    # bf16 weight/activation path (f32 accumulation): looser tolerance.
    out_bf16 = jax.block_until_ready(ensemble_forward(x, params, compute_dtype=jnp.bfloat16))
    assert out_bf16.shape == (num_particles, batch, output_size), out_bf16.shape
    assert jnp.allclose(out_bf16, ref, atol=5e-2, rtol=5e-2), "bf16 mismatch vs reference"

    print("KERNEL_OK")
</pallas_src>

<mosaic_0001>
module attributes {stable_mosaic.version = 11 : i64} {
  func.func @ensemble_mlp_kernel(%arg0: i32, %arg1: memref<8x16xf32, #tpu.memory_space<vmem>>, %arg2: memref<1x16x1024xf32, #tpu.memory_space<vmem>>, %arg3: memref<1x1x1024xf32, #tpu.memory_space<vmem>>, %arg4: memref<1x8x128x128xf32, #tpu.memory_space<vmem>>, %arg5: memref<1x8x1x128xf32, #tpu.memory_space<vmem>>, %arg6: memref<1x8x128x32xf32, #tpu.memory_space<vmem>>, %arg7: memref<1x8x1x32xf32, #tpu.memory_space<vmem>>, %arg8: memref<1x8x256xf32, #tpu.memory_space<vmem>>) attributes {dimension_semantics = [#tpu.dimension_semantics<parallel>], iteration_bounds = array<i64: 1>, scalar_prefetch = 0 : i64, scratch_operands = 0 : i64, tpu.core_type = #tpu.core_type<tc>, window_params = [{pipeline_mode = #tpu.pipeline_mode<synchronous>, transform_indices = @transform_0, window_bounds = array<i64: 8, 16>}, {transform_indices = @transform_1, window_bounds = array<i64: 1, 16, 1024>}, {transform_indices = @transform_2, window_bounds = array<i64: 1, 1, 1024>}, {transform_indices = @transform_3, window_bounds = array<i64: 1, 8, 128, 128>}, {transform_indices = @transform_4, window_bounds = array<i64: 1, 8, 1, 128>}, {transform_indices = @transform_5, window_bounds = array<i64: 1, 8, 128, 32>}, {transform_indices = @transform_6, window_bounds = array<i64: 1, 8, 1, 32>}, {transform_indices = @transform_7, window_bounds = array<i64: 1, 8, 256>}]} {
    %c0 = arith.constant 0 : index
    %c0_0 = arith.constant 0 : index
    %0 = vector.load %arg1[%c0, %c0_0] : memref<8x16xf32, #tpu.memory_space<vmem>>, vector<8x16xf32>
    %c0_1 = arith.constant 0 : index
    %c0_2 = arith.constant 0 : index
    %c0_3 = arith.constant 0 : index
    %1 = vector.load %arg2[%c0_1, %c0_2, %c0_3] : memref<1x16x1024xf32, #tpu.memory_space<vmem>>, vector<1x16x1024xf32>
    %2 = vector.shape_cast %1 : vector<1x16x1024xf32> to vector<16x1024xf32>
    %cst = arith.constant dense<0.000000e+00> : vector<8x1024xf32>
    %3 = tpu.matmul %0, %2, %cst {dimension_numbers = #tpu.dot_dimension_numbers<[1], [0], [0], [1], [0, 0, 1, 1], [], []>} : vector<8x16xf32>, vector<16x1024xf32>, vector<8x1024xf32> -> vector<8x1024xf32>
    %c0_4 = arith.constant 0 : index
    %c0_5 = arith.constant 0 : index
    %c0_6 = arith.constant 0 : index
    %4 = vector.load %arg3[%c0_4, %c0_5, %c0_6] : memref<1x1x1024xf32, #tpu.memory_space<vmem>>, vector<1x1x1024xf32>
    %5 = vector.shape_cast %4 : vector<1x1x1024xf32> to vector<1x1024xf32>
    %6 = vector.broadcast %5 : vector<1x1024xf32> to vector<8x1024xf32>
    %7 = arith.addf %3, %6 : vector<8x1024xf32>
    %cst_7 = arith.constant 0.000000e+00 : f32
    %8 = vector.broadcast %cst_7 : f32 to vector<8x1024xf32>
    %9 = arith.maximumf %7, %8 : vector<8x1024xf32>
    %10 = vector.extract_strided_slice %9 {offsets = [0, 0], sizes = [8, 128], strides = [1, 1]} : vector<8x1024xf32> to vector<8x128xf32>
    %c0_8 = arith.constant 0 : index
    %c0_9 = arith.constant 0 : index
    %c0_10 = arith.constant 0 : index
    %c0_11 = arith.constant 0 : index
    %11 = vector.load %arg4[%c0_8, %c0_9, %c0_10, %c0_11] : memref<1x8x128x128xf32, #tpu.memory_space<vmem>>, vector<1x1x128x128xf32>
    %12 = vector.shape_cast %11 : vector<1x1x128x128xf32> to vector<128x128xf32>
    %cst_12 = arith.constant dense<0.000000e+00> : vector<8x128xf32>
    %13 = tpu.matmul %10, %12, %cst_12 {dimension_numbers = #tpu.dot_dimension_numbers<[1], [0], [0], [1], [0, 0, 1, 1], [], []>} : vector<8x128xf32>, vector<128x128xf32>, vector<8x128xf32> -> vector<8x128xf32>
    %c0_13 = arith.constant 0 : index
    %c0_14 = arith.constant 0 : index
    %c0_15 = arith.constant 0 : index
    %c0_16 = arith.constant 0 : index
    %14 = vector.load %arg5[%c0_13, %c0_14, %c0_15, %c0_16] : memref<1x8x1x128xf32, #tpu.memory_space<vmem>>, vector<1x1x1x128xf32>
    %15 = vector.shape_cast %14 : vector<1x1x1x128xf32> to vector<1x128xf32>
    %16 = vector.broadcast %15 : vector<1x128xf32> to vector<8x128xf32>
    %17 = arith.addf %13, %16 : vector<8x128xf32>
    %cst_17 = arith.constant 0.000000e+00 : f32
    %18 = vector.broadcast %cst_17 : f32 to vector<8x128xf32>
    %19 = arith.maximumf %17, %18 : vector<8x128xf32>
    %c0_18 = arith.constant 0 : index
    %c0_19 = arith.constant 0 : index
    %c0_20 = arith.constant 0 : index
    %c0_21 = arith.constant 0 : index
    %20 = vector.load %arg6[%c0_18, %c0_19, %c0_20, %c0_21] : memref<1x8x128x32xf32, #tpu.memory_space<vmem>>, vector<1x1x128x32xf32>
    %21 = vector.shape_cast %20 : vector<1x1x128x32xf32> to vector<128x32xf32>
    %cst_22 = arith.constant dense<0.000000e+00> : vector<8x32xf32>
    %22 = tpu.matmul %19, %21, %cst_22 {dimension_numbers = #tpu.dot_dimension_numbers<[1], [0], [0], [1], [0, 0, 1, 1], [], []>} : vector<8x128xf32>, vector<128x32xf32>, vector<8x32xf32> -> vector<8x32xf32>
    %c0_23 = arith.constant 0 : index
    %c0_24 = arith.constant 0 : index
    %c0_25 = arith.constant 0 : index
    %c0_26 = arith.constant 0 : index
    %23 = vector.load %arg7[%c0_23, %c0_24, %c0_25, %c0_26] : memref<1x8x1x32xf32, #tpu.memory_space<vmem>>, vector<1x1x1x32xf32>
    %24 = vector.shape_cast %23 : vector<1x1x1x32xf32> to vector<1x32xf32>
    %25 = vector.broadcast %24 : vector<1x32xf32> to vector<8x32xf32>
    %26 = arith.addf %22, %25 : vector<8x32xf32>
    %c0_27 = arith.constant 0 : index
    %c0_28 = arith.constant 0 : index
    %c0_29 = arith.constant 0 : index
    %27 = vector.load %arg8[%c0_27, %c0_28, %c0_29] : memref<1x8x256xf32, #tpu.memory_space<vmem>>, vector<1x8x32xf32>
    %28 = vector.shape_cast %27 : vector<1x8x32xf32> to vector<8x32xf32>
    %29 = vector.shape_cast %26 : vector<8x32xf32> to vector<1x8x32xf32>
    tpu.vector_store %arg8[%c0_27, %c0_28, %c0_29], %29 {strides = array<i32>} : memref<1x8x256xf32, #tpu.memory_space<vmem>>, vector<1x8x32xf32>,
    %30 = vector.extract_strided_slice %9 {offsets = [0, 128], sizes = [8, 128], strides = [1, 1]} : vector<8x1024xf32> to vector<8x128xf32>
    %c0_30 = arith.constant 0 : index
    %c1 = arith.constant 1 : index
    %c0_31 = arith.constant 0 : index
    %c0_32 = arith.constant 0 : index
    %31 = vector.load %arg4[%c0_30, %c1, %c0_31, %c0_32] : memref<1x8x128x128xf32, #tpu.memory_space<vmem>>, vector<1x1x128x128xf32>
    %32 = vector.shape_cast %31 : vector<1x1x128x128xf32> to vector<128x128xf32>
    %cst_33 = arith.constant dense<0.000000e+00> : vector<8x128xf32>
    %33 = tpu.matmul %30, %32, %cst_33 {dimension_numbers = #tpu.dot_dimension_numbers<[1], [0], [0], [1], [0, 0, 1, 1], [], []>} : vector<8x128xf32>, vector<128x128xf32>, vector<8x128xf32> -> vector<8x128xf32>
    %c0_34 = arith.constant 0 : index
    %c1_35 = arith.constant 1 : index
    %c0_36 = arith.constant 0 : index
    %c0_37 = arith.constant 0 : index
    %34 = vector.load %arg5[%c0_34, %c1_35, %c0_36, %c0_37] : memref<1x8x1x128xf32, #tpu.memory_space<vmem>>, vector<1x1x1x128xf32>
    %35 = vector.shape_cast %34 : vector<1x1x1x128xf32> to vector<1x128xf32>
    %36 = vector.broadcast %35 : vector<1x128xf32> to vector<8x128xf32>
    %37 = arith.addf %33, %36 : vector<8x128xf32>
    %cst_38 = arith.constant 0.000000e+00 : f32
    %38 = vector.broadcast %cst_38 : f32 to vector<8x128xf32>
    %39 = arith.maximumf %37, %38 : vector<8x128xf32>
    %c0_39 = arith.constant 0 : index
    %c1_40 = arith.constant 1 : index
    %c0_41 = arith.constant 0 : index
    %c0_42 = arith.constant 0 : index
    %40 = vector.load %arg6[%c0_39, %c1_40, %c0_41, %c0_42] : memref<1x8x128x32xf32, #tpu.memory_space<vmem>>, vector<1x1x128x32xf32>
    %41 = vector.shape_cast %40 : vector<1x1x128x32xf32> to vector<128x32xf32>
    %cst_43 = arith.constant dense<0.000000e+00> : vector<8x32xf32>
    %42 = tpu.matmul %39, %41, %cst_43 {dimension_numbers = #tpu.dot_dimension_numbers<[1], [0], [0], [1], [0, 0, 1, 1], [], []>} : vector<8x128xf32>, vector<128x32xf32>, vector<8x32xf32> -> vector<8x32xf32>
    %c0_44 = arith.constant 0 : index
    %c1_45 = arith.constant 1 : index
    %c0_46 = arith.constant 0 : index
    %c0_47 = arith.constant 0 : index
    %43 = vector.load %arg7[%c0_44, %c1_45, %c0_46, %c0_47] : memref<1x8x1x32xf32, #tpu.memory_space<vmem>>, vector<1x1x1x32xf32>
    %44 = vector.shape_cast %43 : vector<1x1x1x32xf32> to vector<1x32xf32>
    %45 = vector.broadcast %44 : vector<1x32xf32> to vector<8x32xf32>
    %46 = arith.addf %42, %45 : vector<8x32xf32>
    %c0_48 = arith.constant 0 : index
    %c0_49 = arith.constant 0 : index
    %c32 = arith.constant 32 : index
    %47 = vector.load %arg8[%c0_48, %c0_49, %c32] : memref<1x8x256xf32, #tpu.memory_space<vmem>>, vector<1x8x32xf32>
    %48 = vector.shape_cast %47 : vector<1x8x32xf32> to vector<8x32xf32>
    %49 = vector.shape_cast %46 : vector<8x32xf32> to vector<1x8x32xf32>
    tpu.vector_store %arg8[%c0_48, %c0_49, %c32], %49 {strides = array<i32>} : memref<1x8x256xf32, #tpu.memory_space<vmem>>, vector<1x8x32xf32>,
    %50 = vector.extract_strided_slice %9 {offsets = [0, 256], sizes = [8, 128], strides = [1, 1]} : vector<8x1024xf32> to vector<8x128xf32>
    %c0_50 = arith.constant 0 : index
    %c2 = arith.constant 2 : index
    %c0_51 = arith.constant 0 : index
    %c0_52 = arith.constant 0 : index
    %51 = vector.load %arg4[%c0_50, %c2, %c0_51, %c0_52] : memref<1x8x128x128xf32, #tpu.memory_space<vmem>>, vector<1x1x128x128xf32>
    %52 = vector.shape_cast %51 : vector<1x1x128x128xf32> to vector<128x128xf32>
    %cst_53 = arith.constant dense<0.000000e+00> : vector<8x128xf32>
    %53 = tpu.matmul %50, %52, %cst_53 {dimension_numbers = #tpu.dot_dimension_numbers<[1], [0], [0], [1], [0, 0, 1, 1], [], []>} : vector<8x128xf32>, vector<128x128xf32>, vector<8x128xf32> -> vector<8x128xf32>
    %c0_54 = arith.constant 0 : index
    %c2_55 = arith.constant 2 : index
    %c0_56 = arith.constant 0 : index
    %c0_57 = arith.constant 0 : index
    %54 = vector.load %arg5[%c0_54, %c2_55, %c0_56, %c0_57] : memref<1x8x1x128xf32, #tpu.memory_space<vmem>>, vector<1x1x1x128xf32>
    %55 = vector.shape_cast %54 : vector<1x1x1x128xf32> to vector<1x128xf32>
    %56 = vector.broadcast %55 : vector<1x128xf32> to vector<8x128xf32>
    %57 = arith.addf %53, %56 : vector<8x128xf32>
    %cst_58 = arith.constant 0.000000e+00 : f32
    %58 = vector.broadcast %cst_58 : f32 to vector<8x128xf32>
    %59 = arith.maximumf %57, %58 : vector<8x128xf32>
    %c0_59 = arith.constant 0 : index
    %c2_60 = arith.constant 2 : index
    %c0_61 = arith.constant 0 : index
    %c0_62 = arith.constant 0 : index
    %60 = vector.load %arg6[%c0_59, %c2_60, %c0_61, %c0_62] : memref<1x8x128x32xf32, #tpu.memory_space<vmem>>, vector<1x1x128x32xf32>
    %61 = vector.shape_cast %60 : vector<1x1x128x32xf32> to vector<128x32xf32>
    %cst_63 = arith.constant dense<0.000000e+00> : vector<8x32xf32>
    %62 = tpu.matmul %59, %61, %cst_63 {dimension_numbers = #tpu.dot_dimension_numbers<[1], [0], [0], [1], [0, 0, 1, 1], [], []>} : vector<8x128xf32>, vector<128x32xf32>, vector<8x32xf32> -> vector<8x32xf32>
    %c0_64 = arith.constant 0 : index
    %c2_65 = arith.constant 2 : index
    %c0_66 = arith.constant 0 : index
    %c0_67 = arith.constant 0 : index
    %63 = vector.load %arg7[%c0_64, %c2_65, %c0_66, %c0_67] : memref<1x8x1x32xf32, #tpu.memory_space<vmem>>, vector<1x1x1x32xf32>
    %64 = vector.shape_cast %63 : vector<1x1x1x32xf32> to vector<1x32xf32>
    %65 = vector.broadcast %64 : vector<1x32xf32> to vector<8x32xf32>
    %66 = arith.addf %62, %65 : vector<8x32xf32>
    %c0_68 = arith.constant 0 : index
    %c0_69 = arith.constant 0 : index
    %c64 = arith.constant 64 : index
    %67 = vector.load %arg8[%c0_68, %c0_69, %c64] : memref<1x8x256xf32, #tpu.memory_space<vmem>>, vector<1x8x32xf32>
    %68 = vector.shape_cast %67 : vector<1x8x32xf32> to vector<8x32xf32>
    %69 = vector.shape_cast %66 : vector<8x32xf32> to vector<1x8x32xf32>
    tpu.vector_store %arg8[%c0_68, %c0_69, %c64], %69 {strides = array<i32>} : memref<1x8x256xf32, #tpu.memory_space<vmem>>, vector<1x8x32xf32>,
    %70 = vector.extract_strided_slice %9 {offsets = [0, 384], sizes = [8, 128], strides = [1, 1]} : vector<8x1024xf32> to vector<8x128xf32>
    %c0_70 = arith.constant 0 : index
    %c3 = arith.constant 3 : index
    %c0_71 = arith.constant 0 : index
    %c0_72 = arith.constant 0 : index
    %71 = vector.load %arg4[%c0_70, %c3, %c0_71, %c0_72] : memref<1x8x128x128xf32, #tpu.memory_space<vmem>>, vector<1x1x128x128xf32>
    %72 = vector.shape_cast %71 : vector<1x1x128x128xf32> to vector<128x128xf32>
    %cst_73 = arith.constant dense<0.000000e+00> : vector<8x128xf32>
    %73 = tpu.matmul %70, %72, %cst_73 {dimension_numbers = #tpu.dot_dimension_numbers<[1], [0], [0], [1], [0, 0, 1, 1], [], []>} : vector<8x128xf32>, vector<128x128xf32>, vector<8x128xf32> -> vector<8x128xf32>
    %c0_74 = arith.constant 0 : index
    %c3_75 = arith.constant 3 : index
    %c0_76 = arith.constant 0 : index
    %c0_77 = arith.constant 0 : index
    %74 = vector.load %arg5[%c0_74, %c3_75, %c0_76, %c0_77] : memref<1x8x1x128xf32, #tpu.memory_space<vmem>>, vector<1x1x1x128xf32>
    %75 = vector.shape_cast %74 : vector<1x1x1x128xf32> to vector<1x128xf32>
    %76 = vector.broadcast %75 : vector<1x128xf32> to vector<8x128xf32>
    %77 = arith.addf %73, %76 : vector<8x128xf32>
    %cst_78 = arith.constant 0.000000e+00 : f32
    %78 = vector.broadcast %cst_78 : f32 to vector<8x128xf32>
    %79 = arith.maximumf %77, %78 : vector<8x128xf32>
    %c0_79 = arith.constant 0 : index
    %c3_80 = arith.constant 3 : index
    %c0_81 = arith.constant 0 : index
    %c0_82 = arith.constant 0 : index
    %80 = vector.load %arg6[%c0_79, %c3_80, %c0_81, %c0_82] : memref<1x8x128x32xf32, #tpu.memory_space<vmem>>, vector<1x1x128x32xf32>
    %81 = vector.shape_cast %80 : vector<1x1x128x32xf32> to vector<128x32xf32>
    %cst_83 = arith.constant dense<0.000000e+00> : vector<8x32xf32>
    %82 = tpu.matmul %79, %81, %cst_83 {dimension_numbers = #tpu.dot_dimension_numbers<[1], [0], [0], [1], [0, 0, 1, 1], [], []>} : vector<8x128xf32>, vector<128x32xf32>, vector<8x32xf32> -> vector<8x32xf32>
    %c0_84 = arith.constant 0 : index
    %c3_85 = arith.constant 3 : index
    %c0_86 = arith.constant 0 : index
    %c0_87 = arith.constant 0 : index
    %83 = vector.load %arg7[%c0_84, %c3_85, %c0_86, %c0_87] : memref<1x8x1x32xf32, #tpu.memory_space<vmem>>, vector<1x1x1x32xf32>
    %84 = vector.shape_cast %83 : vector<1x1x1x32xf32> to vector<1x32xf32>
    %85 = vector.broadcast %84 : vector<1x32xf32> to vector<8x32xf32>
    %86 = arith.addf %82, %85 : vector<8x32xf32>
    %c0_88 = arith.constant 0 : index
    %c0_89 = arith.constant 0 : index
    %c96 = arith.constant 96 : index
    %87 = vector.load %arg8[%c0_88, %c0_89, %c96] : memref<1x8x256xf32, #tpu.memory_space<vmem>>, vector<1x8x32xf32>
    %88 = vector.shape_cast %87 : vector<1x8x32xf32> to vector<8x32xf32>
    %89 = vector.shape_cast %86 : vector<8x32xf32> to vector<1x8x32xf32>
    tpu.vector_store %arg8[%c0_88, %c0_89, %c96], %89 {strides = array<i32>} : memref<1x8x256xf32, #tpu.memory_space<vmem>>, vector<1x8x32xf32>,
    %90 = vector.extract_strided_slice %9 {offsets = [0, 512], sizes = [8, 128], strides = [1, 1]} : vector<8x1024xf32> to vector<8x128xf32>
    %c0_90 = arith.constant 0 : index
    %c4 = arith.constant 4 : index
    %c0_91 = arith.constant 0 : index
    %c0_92 = arith.constant 0 : index
    %91 = vector.load %arg4[%c0_90, %c4, %c0_91, %c0_92] : memref<1x8x128x128xf32, #tpu.memory_space<vmem>>, vector<1x1x128x128xf32>
    %92 = vector.shape_cast %91 : vector<1x1x128x128xf32> to vector<128x128xf32>
    %cst_93 = arith.constant dense<0.000000e+00> : vector<8x128xf32>
    %93 = tpu.matmul %90, %92, %cst_93 {dimension_numbers = #tpu.dot_dimension_numbers<[1], [0], [0], [1], [0, 0, 1, 1], [], []>} : vector<8x128xf32>, vector<128x128xf32>, vector<8x128xf32> -> vector<8x128xf32>
    %c0_94 = arith.constant 0 : index
    %c4_95 = arith.constant 4 : index
    %c0_96 = arith.constant 0 : index
    %c0_97 = arith.constant 0 : index
    %94 = vector.load %arg5[%c0_94, %c4_95, %c0_96, %c0_97] : memref<1x8x1x128xf32, #tpu.memory_space<vmem>>, vector<1x1x1x128xf32>
    %95 = vector.shape_cast %94 : vector<1x1x1x128xf32> to vector<1x128xf32>
    %96 = vector.broadcast %95 : vector<1x128xf32> to vector<8x128xf32>
    %97 = arith.addf %93, %96 : vector<8x128xf32>
    %cst_98 = arith.constant 0.000000e+00 : f32
    %98 = vector.broadcast %cst_98 : f32 to vector<8x128xf32>
    %99 = arith.maximumf %97, %98 : vector<8x128xf32>
    %c0_99 = arith.constant 0 : index
    %c4_100 = arith.constant 4 : index
    %c0_101 = arith.constant 0 : index
    %c0_102 = arith.constant 0 : index
    %100 = vector.load %arg6[%c0_99, %c4_100, %c0_101, %c0_102] : memref<1x8x128x32xf32, #tpu.memory_space<vmem>>, vector<1x1x128x32xf32>
    %101 = vector.shape_cast %100 : vector<1x1x128x32xf32> to vector<128x32xf32>
    %cst_103 = arith.constant dense<0.000000e+00> : vector<8x32xf32>
    %102 = tpu.matmul %99, %101, %cst_103 {dimension_numbers = #tpu.dot_dimension_numbers<[1], [0], [0], [1], [0, 0, 1, 1], [], []>} : vector<8x128xf32>, vector<128x32xf32>, vector<8x32xf32> -> vector<8x32xf32>
    %c0_104 = arith.constant 0 : index
    %c4_105 = arith.constant 4 : index
    %c0_106 = arith.constant 0 : index
    %c0_107 = arith.constant 0 : index
    %103 = vector.load %arg7[%c0_104, %c4_105, %c0_106, %c0_107] : memref<1x8x1x32xf32, #tpu.memory_space<vmem>>, vector<1x1x1x32xf32>
    %104 = vector.shape_cast %103 : vector<1x1x1x32xf32> to vector<1x32xf32>
    %105 = vector.broadcast %104 : vector<1x32xf32> to vector<8x32xf32>
    %106 = arith.addf %102, %105 : vector<8x32xf32>
    %c0_108 = arith.constant 0 : index
    %c0_109 = arith.constant 0 : index
    %c128 = arith.constant 128 : index
    %107 = vector.load %arg8[%c0_108, %c0_109, %c128] : memref<1x8x256xf32, #tpu.memory_space<vmem>>, vector<1x8x32xf32>
    %108 = vector.shape_cast %107 : vector<1x8x32xf32> to vector<8x32xf32>
    %109 = vector.shape_cast %106 : vector<8x32xf32> to vector<1x8x32xf32>
    tpu.vector_store %arg8[%c0_108, %c0_109, %c128], %109 {strides = array<i32>} : memref<1x8x256xf32, #tpu.memory_space<vmem>>, vector<1x8x32xf32>,
    %110 = vector.extract_strided_slice %9 {offsets = [0, 640], sizes = [8, 128], strides = [1, 1]} : vector<8x1024xf32> to vector<8x128xf32>
    %c0_110 = arith.constant 0 : index
    %c5 = arith.constant 5 : index
    %c0_111 = arith.constant 0 : index
    %c0_112 = arith.constant 0 : index
    %111 = vector.load %arg4[%c0_110, %c5, %c0_111, %c0_112] : memref<1x8x128x128xf32, #tpu.memory_space<vmem>>, vector<1x1x128x128xf32>
    %112 = vector.shape_cast %111 : vector<1x1x128x128xf32> to vector<128x128xf32>
    %cst_113 = arith.constant dense<0.000000e+00> : vector<8x128xf32>
    %113 = tpu.matmul %110, %112, %cst_113 {dimension_numbers = #tpu.dot_dimension_numbers<[1], [0], [0], [1], [0, 0, 1, 1], [], []>} : vector<8x128xf32>, vector<128x128xf32>, vector<8x128xf32> -> vector<8x128xf32>
    %c0_114 = arith.constant 0 : index
    %c5_115 = arith.constant 5 : index
    %c0_116 = arith.constant 0 : index
    %c0_117 = arith.constant 0 : index
    %114 = vector.load %arg5[%c0_114, %c5_115, %c0_116, %c0_117] : memref<1x8x1x128xf32, #tpu.memory_space<vmem>>, vector<1x1x1x128xf32>
    %115 = vector.shape_cast %114 : vector<1x1x1x128xf32> to vector<1x128xf32>
    %116 = vector.broadcast %115 : vector<1x128xf32> to vector<8x128xf32>
    %117 = arith.addf %113, %116 : vector<8x128xf32>
    %cst_118 = arith.constant 0.000000e+00 : f32
    %118 = vector.broadcast %cst_118 : f32 to vector<8x128xf32>
    %119 = arith.maximumf %117, %118 : vector<8x128xf32>
    %c0_119 = arith.constant 0 : index
    %c5_120 = arith.constant 5 : index
    %c0_121 = arith.constant 0 : index
    %c0_122 = arith.constant 0 : index
    %120 = vector.load %arg6[%c0_119, %c5_120, %c0_121, %c0_122] : memref<1x8x128x32xf32, #tpu.memory_space<vmem>>, vector<1x1x128x32xf32>
    %121 = vector.shape_cast %120 : vector<1x1x128x32xf32> to vector<128x32xf32>
    %cst_123 = arith.constant dense<0.000000e+00> : vector<8x32xf32>
    %122 = tpu.matmul %119, %121, %cst_123 {dimension_numbers = #tpu.dot_dimension_numbers<[1], [0], [0], [1], [0, 0, 1, 1], [], []>} : vector<8x128xf32>, vector<128x32xf32>, vector<8x32xf32> -> vector<8x32xf32>
    %c0_124 = arith.constant 0 : index
    %c5_125 = arith.constant 5 : index
    %c0_126 = arith.constant 0 : index
    %c0_127 = arith.constant 0 : index
    %123 = vector.load %arg7[%c0_124, %c5_125, %c0_126, %c0_127] : memref<1x8x1x32xf32, #tpu.memory_space<vmem>>, vector<1x1x1x32xf32>
    %124 = vector.shape_cast %123 : vector<1x1x1x32xf32> to vector<1x32xf32>
    %125 = vector.broadcast %124 : vector<1x32xf32> to vector<8x32xf32>
    %126 = arith.addf %122, %125 : vector<8x32xf32>
    %c0_128 = arith.constant 0 : index
    %c0_129 = arith.constant 0 : index
    %c160 = arith.constant 160 : index
    %127 = vector.load %arg8[%c0_128, %c0_129, %c160] : memref<1x8x256xf32, #tpu.memory_space<vmem>>, vector<1x8x32xf32>
    %128 = vector.shape_cast %127 : vector<1x8x32xf32> to vector<8x32xf32>
    %129 = vector.shape_cast %126 : vector<8x32xf32> to vector<1x8x32xf32>
    tpu.vector_store %arg8[%c0_128, %c0_129, %c160], %129 {strides = array<i32>} : memref<1x8x256xf32, #tpu.memory_space<vmem>>, vector<1x8x32xf32>,
    %130 = vector.extract_strided_slice %9 {offsets = [0, 768], sizes = [8, 128], strides = [1, 1]} : vector<8x1024xf32> to vector<8x128xf32>
    %c0_130 = arith.constant 0 : index
    %c6 = arith.constant 6 : index
    %c0_131 = arith.constant 0 : index
    %c0_132 = arith.constant 0 : index
    %131 = vector.load %arg4[%c0_130, %c6, %c0_131, %c0_132] : memref<1x8x128x128xf32, #tpu.memory_space<vmem>>, vector<1x1x128x128xf32>
    %132 = vector.shape_cast %131 : vector<1x1x128x128xf32> to vector<128x128xf32>
    %cst_133 = arith.constant dense<0.000000e+00> : vector<8x128xf32>
    %133 = tpu.matmul %130, %132, %cst_133 {dimension_numbers = #tpu.dot_dimension_numbers<[1], [0], [0], [1], [0, 0, 1, 1], [], []>} : vector<8x128xf32>, vector<128x128xf32>, vector<8x128xf32> -> vector<8x128xf32>
    %c0_134 = arith.constant 0 : index
    %c6_135 = arith.constant 6 : index
    %c0_136 = arith.constant 0 : index
    %c0_137 = arith.constant 0 : index
    %134 = vector.load %arg5[%c0_134, %c6_135, %c0_136, %c0_137] : memref<1x8x1x128xf32, #tpu.memory_space<vmem>>, vector<1x1x1x128xf32>
    %135 = vector.shape_cast %134 : vector<1x1x1x128xf32> to vector<1x128xf32>
    %136 = vector.broadcast %135 : vector<1x128xf32> to vector<8x128xf32>
    %137 = arith.addf %133, %136 : vector<8x128xf32>
    %cst_138 = arith.constant 0.000000e+00 : f32
    %138 = vector.broadcast %cst_138 : f32 to vector<8x128xf32>
    %139 = arith.maximumf %137, %138 : vector<8x128xf32>
    %c0_139 = arith.constant 0 : index
    %c6_140 = arith.constant 6 : index
    %c0_141 = arith.constant 0 : index
    %c0_142 = arith.constant 0 : index
    %140 = vector.load %arg6[%c0_139, %c6_140, %c0_141, %c0_142] : memref<1x8x128x32xf32, #tpu.memory_space<vmem>>, vector<1x1x128x32xf32>
    %141 = vector.shape_cast %140 : vector<1x1x128x32xf32> to vector<128x32xf32>
    %cst_143 = arith.constant dense<0.000000e+00> : vector<8x32xf32>
    %142 = tpu.matmul %139, %141, %cst_143 {dimension_numbers = #tpu.dot_dimension_numbers<[1], [0], [0], [1], [0, 0, 1, 1], [], []>} : vector<8x128xf32>, vector<128x32xf32>, vector<8x32xf32> -> vector<8x32xf32>
    %c0_144 = arith.constant 0 : index
    %c6_145 = arith.constant 6 : index
    %c0_146 = arith.constant 0 : index
    %c0_147 = arith.constant 0 : index
    %143 = vector.load %arg7[%c0_144, %c6_145, %c0_146, %c0_147] : memref<1x8x1x32xf32, #tpu.memory_space<vmem>>, vector<1x1x1x32xf32>
    %144 = vector.shape_cast %143 : vector<1x1x1x32xf32> to vector<1x32xf32>
    %145 = vector.broadcast %144 : vector<1x32xf32> to vector<8x32xf32>
    %146 = arith.addf %142, %145 : vector<8x32xf32>
    %c0_148 = arith.constant 0 : index
    %c0_149 = arith.constant 0 : index
    %c192 = arith.constant 192 : index
    %147 = vector.load %arg8[%c0_148, %c0_149, %c192] : memref<1x8x256xf32, #tpu.memory_space<vmem>>, vector<1x8x32xf32>
    %148 = vector.shape_cast %147 : vector<1x8x32xf32> to vector<8x32xf32>
    %149 = vector.shape_cast %146 : vector<8x32xf32> to vector<1x8x32xf32>
    tpu.vector_store %arg8[%c0_148, %c0_149, %c192], %149 {strides = array<i32>} : memref<1x8x256xf32, #tpu.memory_space<vmem>>, vector<1x8x32xf32>,
    %150 = vector.extract_strided_slice %9 {offsets = [0, 896], sizes = [8, 128], strides = [1, 1]} : vector<8x1024xf32> to vector<8x128xf32>
    %c0_150 = arith.constant 0 : index
    %c7 = arith.constant 7 : index
    %c0_151 = arith.constant 0 : index
    %c0_152 = arith.constant 0 : index
    %151 = vector.load %arg4[%c0_150, %c7, %c0_151, %c0_152] : memref<1x8x128x128xf32, #tpu.memory_space<vmem>>, vector<1x1x128x128xf32>
    %152 = vector.shape_cast %151 : vector<1x1x128x128xf32> to vector<128x128xf32>
    %cst_153 = arith.constant dense<0.000000e+00> : vector<8x128xf32>
    %153 = tpu.matmul %150, %152, %cst_153 {dimension_numbers = #tpu.dot_dimension_numbers<[1], [0], [0], [1], [0, 0, 1, 1], [], []>} : vector<8x128xf32>, vector<128x128xf32>, vector<8x128xf32> -> vector<8x128xf32>
    %c0_154 = arith.constant 0 : index
    %c7_155 = arith.constant 7 : index
    %c0_156 = arith.constant 0 : index
    %c0_157 = arith.constant 0 : index
    %154 = vector.load %arg5[%c0_154, %c7_155, %c0_156, %c0_157] : memref<1x8x1x128xf32, #tpu.memory_space<vmem>>, vector<1x1x1x128xf32>
    %155 = vector.shape_cast %154 : vector<1x1x1x128xf32> to vector<1x128xf32>
    %156 = vector.broadcast %155 : vector<1x128xf32> to vector<8x128xf32>
    %157 = arith.addf %153, %156 : vector<8x128xf32>
    %cst_158 = arith.constant 0.000000e+00 : f32
    %158 = vector.broadcast %cst_158 : f32 to vector<8x128xf32>
    %159 = arith.maximumf %157, %158 : vector<8x128xf32>
    %c0_159 = arith.constant 0 : index
    %c7_160 = arith.constant 7 : index
    %c0_161 = arith.constant 0 : index
    %c0_162 = arith.constant 0 : index
    %160 = vector.load %arg6[%c0_159, %c7_160, %c0_161, %c0_162] : memref<1x8x128x32xf32, #tpu.memory_space<vmem>>, vector<1x1x128x32xf32>
    %161 = vector.shape_cast %160 : vector<1x1x128x32xf32> to vector<128x32xf32>
    %cst_163 = arith.constant dense<0.000000e+00> : vector<8x32xf32>
    %162 = tpu.matmul %159, %161, %cst_163 {dimension_numbers = #tpu.dot_dimension_numbers<[1], [0], [0], [1], [0, 0, 1, 1], [], []>} : vector<8x128xf32>, vector<128x32xf32>, vector<8x32xf32> -> vector<8x32xf32>
    %c0_164 = arith.constant 0 : index
    %c7_165 = arith.constant 7 : index
    %c0_166 = arith.constant 0 : index
    %c0_167 = arith.constant 0 : index
    %163 = vector.load %arg7[%c0_164, %c7_165, %c0_166, %c0_167] : memref<1x8x1x32xf32, #tpu.memory_space<vmem>>, vector<1x1x1x32xf32>
    %164 = vector.shape_cast %163 : vector<1x1x1x32xf32> to vector<1x32xf32>
    %165 = vector.broadcast %164 : vector<1x32xf32> to vector<8x32xf32>
    %166 = arith.addf %162, %165 : vector<8x32xf32>
    %c0_168 = arith.constant 0 : index
    %c0_169 = arith.constant 0 : index
    %c224 = arith.constant 224 : index
    %167 = vector.load %arg8[%c0_168, %c0_169, %c224] : memref<1x8x256xf32, #tpu.memory_space<vmem>>, vector<1x8x32xf32>
    %168 = vector.shape_cast %167 : vector<1x8x32xf32> to vector<8x32xf32>
    %169 = vector.shape_cast %166 : vector<8x32xf32> to vector<1x8x32xf32>
    tpu.vector_store %arg8[%c0_168, %c0_169, %c224], %169 {strides = array<i32>} : memref<1x8x256xf32, #tpu.memory_space<vmem>>, vector<1x8x32xf32>,
    return
  }
  func.func @transform_0(%arg0: i32) -> (i32, i32) {
    %c0_i32 = arith.constant 0 : i32
    %c0_i32_0 = arith.constant 0 : i32
    %c0_i32_1 = arith.constant 0 : i32
    return %c0_i32, %c0_i32_0 : i32, i32
  }
  func.func @transform_1(%arg0: i32) -> (i32, i32, i32) {
    %c0_i32 = arith.constant 0 : i32
    %c0_i32_0 = arith.constant 0 : i32
    %c0_i32_1 = arith.constant 0 : i32
    return %arg0, %c0_i32, %c0_i32_0 : i32, i32, i32
  }
  func.func @transform_2(%arg0: i32) -> (i32, i32, i32) {
    %c0_i32 = arith.constant 0 : i32
    %c0_i32_0 = arith.constant 0 : i32
    %c0_i32_1 = arith.constant 0 : i32
    return %arg0, %c0_i32, %c0_i32_0 : i32, i32, i32
  }
  func.func @transform_3(%arg0: i32) -> (i32, i32, i32, i32) {
    %c0_i32 = arith.constant 0 : i32
    %c0_i32_0 = arith.constant 0 : i32
    %c0_i32_1 = arith.constant 0 : i32
    %c0_i32_2 = arith.constant 0 : i32
    return %arg0, %c0_i32, %c0_i32_0, %c0_i32_1 : i32, i32, i32, i32
  }
  func.func @transform_4(%arg0: i32) -> (i32, i32, i32, i32) {
    %c0_i32 = arith.constant 0 : i32
    %c0_i32_0 = arith.constant 0 : i32
    %c0_i32_1 = arith.constant 0 : i32
    %c0_i32_2 = arith.constant 0 : i32
    return %arg0, %c0_i32, %c0_i32_0, %c0_i32_1 : i32, i32, i32, i32
  }
  func.func @transform_5(%arg0: i32) -> (i32, i32, i32, i32) {
    %c0_i32 = arith.constant 0 : i32
    %c0_i32_0 = arith.constant 0 : i32
    %c0_i32_1 = arith.constant 0 : i32
    %c0_i32_2 = arith.constant 0 : i32
    return %arg0, %c0_i32, %c0_i32_0, %c0_i32_1 : i32, i32, i32, i32
  }
  func.func @transform_6(%arg0: i32) -> (i32, i32, i32, i32) {
    %c0_i32 = arith.constant 0 : i32
    %c0_i32_0 = arith.constant 0 : i32
    %c0_i32_1 = arith.constant 0 : i32
    %c0_i32_2 = arith.constant 0 : i32
    return %arg0, %c0_i32, %c0_i32_0, %c0_i32_1 : i32, i32, i32, i32
  }
  func.func @transform_7(%arg0: i32) -> (i32, i32, i32) {
    %c0_i32 = arith.constant 0 : i32
    %c0_i32_0 = arith.constant 0 : i32
    %c0_i32_1 = arith.constant 0 : i32
    return %arg0, %c0_i32, %c0_i32_0 : i32, i32, i32
  }
}

</mosaic_0001>

<bundles_post_ra>
// kernel: tpu_custom_call.1
= control target key start
LH: loop header
LB: loop body
LE: loop exit
PB: predicated region body
PF: predicated region fallthrough
CT: control target
= control target key end

     0   :  { %vm62_vm0 = vcmask 130048   ;;  %s2193_s0 = inlined_call_operand.vmem [shape: f32[8,16], index: 0, kind: input, shape index: {}]   ;;  %s2194_s1 = inlined_call_operand.vmem [shape: f32[1,16,1024], index: 1, kind: input, shape index: {}]   ;;  %s2195_s2 = inlined_call_operand.vmem [shape: f32[1,1,1024], index: 2, kind: input, shape index: {}]   ;;  %s2196_s3 = inlined_call_operand.vmem [shape: f32[1,8,128,128], index: 3, kind: input, shape index: {}]   ;;  %s2197_s4 = inlined_call_operand.vmem [shape: f32[1,8,1,128], index: 4, kind: input, shape index: {}]   ;;  %s2198_s5 = inlined_call_operand.vmem [shape: f32[1,8,128,32], index: 5, kind: input, shape index: {}]   ;;  %s2199_s6 = inlined_call_operand.vmem [shape: f32[1,8,1,32], index: 6, kind: input, shape index: {}]   ;;  %s2200_s7 = inlined_call_operand.hbm [shape: f32[1,8,256], index: 7, kind: output, shape index: {}]  }
   0x1   :  { %v36_v0 = vld [vmem:[%s2194_s1 + $0x40] sm:$0xff]  ;;  %v37_v3 = vld [vmem:[%s2194_s1 + $0x48] sm:$0xff]  ;;  %v38_v5 = vld [vmem:[%s2194_s1 + $0x50] sm:$0xff] }
   0x2   :  { %v28_v1 = vld [vmem:[%s2194_s1] sm:$0xff]  ;;  %80 = vmatpush.msra.mxu0 %v36_v0  ;;  %v29_v4 = vld [vmem:[%s2194_s1 + $0x8] sm:$0xff]  ;;  %100 = vmatpush.msra.mxu1 %v37_v3  ;;  %v30_v6 = vld [vmem:[%s2194_s1 + $0x10] sm:$0xff] }
   0x3   :  { %v27_v2 = vld [vmem:[%s2193_s0] sm:$0xff]  ;;  %120 = vmatpush.msra.mxu2 %v38_v5  ;;  %v39_v7 = vld [vmem:[%s2194_s1 + $0x58] sm:$0xff]  ;;  %v41_v9 = vld [vmem:[%s2194_s1 + $0x68] sm:$0xff] }
   0x4   :  { %81 = vmatpush.msra.mxu0 %v28_v1  ;;  %140 = vmatpush.msra.mxu3 %v39_v7  ;;  %v31_v8 = vld [vmem:[%s2194_s1 + $0x18] sm:$0xff]  ;;  %v40_v10 = vld [vmem:[%s2194_s1 + $0x60] sm:$0xff]  ;;  %v42_v11 = vld [vmem:[%s2194_s1 + $0x70] sm:$0xff] }
   0x5   :  { %962 = vmatmul.msk.f32.vlgmr.msra.gmra.mxu0 %vm62_vm0, %v27_v2  ;;  %101 = vmatpush.msra.mxu1 %v29_v4  ;;  %v33_v12 = vld [vmem:[%s2194_s1 + $0x28] sm:$0xff]  ;;  %v43_v13 = vld [vmem:[%s2194_s1 + $0x78] sm:$0xff]  ;;  %v32_v14 = vld [vmem:[%s2194_s1 + $0x20] sm:$0xff] }
   0x6   :  { %963 = vmatmul.msk.f32.vlgmr.msra.gmra.mxu1 %vm62_vm0, %v27_v2  ;;  %121 = vmatpush.msra.mxu2 %v30_v6  ;;  %v34_v15 = vld [vmem:[%s2194_s1 + $0x30] sm:$0xff]  ;;  %v35_v16 = vld [vmem:[%s2194_s1 + $0x38] sm:$0xff]  ;;  %v247_v20 = vld [vmem:[%s2196_s3 + $0x68] sm:$0xff] }
   0x7   :  { %964 = vmatmul.msk.f32.vlgmr.msra.gmra.mxu2 %vm62_vm0, %v27_v2  ;;  %141 = vmatpush.msra.mxu3 %v31_v8  ;;  %v249_v17 = vld [vmem:[%s2196_s3 + $0x78] sm:$0xff]  ;;  %v248_v19 = vld [vmem:[%s2196_s3 + $0x70] sm:$0xff]  ;;  %v246_v22 = vld [vmem:[%s2196_s3 + $0x60] sm:$0xff] }
   0x8   :  { %965 = vmatmul.msk.f32.vlgmr.msra.gmra.mxu3 %vm62_vm0, %v27_v2  ;;  %180 = vmatpush.msrb.mxu1 %v41_v9  ;;  %v985_v18 = vld [vmem:[%s2196_s3 + $0xf8] sm:$0xff]  ;;  %v984_v21 = vld [vmem:[%s2196_s3 + $0xf0] sm:$0xff]  ;;  %v983_v23 = vld [vmem:[%s2196_s3 + $0xe8] sm:$0xff] }
   0x9   :  { %160 = vmatpush.msrb.mxu0 %v40_v10  ;;  %200 = vmatpush.msrb.mxu2 %v42_v11  ;;  %v245_v24 = vld [vmem:[%s2196_s3 + $0x58] sm:$0xff]  ;;  %v982_v25 = vld [vmem:[%s2196_s3 + $0xe0] sm:$0xff]  ;;  %v244_v26 = vld [vmem:[%s2196_s3 + $0x50] sm:$0xff] }
   0xa   :  { %181 = vmatpush.msrb.mxu1 %v33_v12  ;;  %220 = vmatpush.msrb.mxu3 %v43_v13  ;;  %v981_v27 = vld [vmem:[%s2196_s3 + $0xd8] sm:$0xff]  ;;  %v243_v28 = vld [vmem:[%s2196_s3 + $0x48] sm:$0xff]  ;;  %v980_v29 = vld [vmem:[%s2196_s3 + $0xd0] sm:$0xff] }
   0xb   :  { %161 = vmatpush.msrb.mxu0 %v32_v14  ;;  %201 = vmatpush.msrb.mxu2 %v34_v15  ;;  %v242_v30 = vld [vmem:[%s2196_s3 + $0x40] sm:$0xff]  ;;  %v979_v31 = vld [vmem:[%s2196_s3 + $0xc8] sm:$0xff]  ;;  %v241_v32 = vld [vmem:[%s2196_s3 + $0x38] sm:$0xff] }
   0xc   :  { %221 = vmatpush.msrb.mxu3 %v35_v16  ;;  %v978_v33 = vld [vmem:[%s2196_s3 + $0xc0] sm:$0xff] }
   0xd   :  { %254 = vmatpush.msra.mxu0 %v249_v17  ;;  %339 = vmatpush.msra.mxu2 %v985_v18 }
   0xe   :  { %966 = vmatmul.msk.f32.vlgmr.msrb.gmra.mxu0 %vm62_vm0, %v27_v2  ;;  %967 = vmatmul.msk.f32.vlgmr.msrb.gmra.mxu1 %vm62_vm0, %v27_v2 }
   0xf   :  { %255 = vmatpush.msra.mxu0 %v248_v19  ;;  %968 = vmatmul.msk.f32.vlgmr.msrb.gmra.mxu2 %vm62_vm0, %v27_v2 }
  0x10   :  { %969 = vmatmul.msk.f32.vlgmr.msrb.gmra.mxu3 %vm62_vm0, %v27_v2  ;;  %340 = vmatpush.msra.mxu2 %v984_v21 }
  0x11   :  { %256 = vmatpush.msra.mxu0 %v247_v20 }
  0x12   :  { %341 = vmatpush.msra.mxu2 %v983_v23 }
  0x13   :  { %257 = vmatpush.msra.mxu0 %v246_v22 }
  0x14   :  { %342 = vmatpush.msra.mxu2 %v982_v25 }
  0x15   :  { %258 = vmatpush.msra.mxu0 %v245_v24 }
  0x16   :  { %343 = vmatpush.msra.mxu2 %v981_v27 }
  0x17   :  { %259 = vmatpush.msra.mxu0 %v244_v26 }
  0x18   :  { %344 = vmatpush.msra.mxu2 %v980_v29 }
  0x19   :  { %260 = vmatpush.msra.mxu0 %v243_v28 }
  0x1b   :  { %261 = vmatpush.msra.mxu0 %v242_v30 }
  0x1c   :  { %12 = vsyncpa [#allocation3], 0  ;;  %v240_v34 = vld [vmem:[%s2196_s3 + $0x30] sm:$0xff]  ;;  %345 = vmatpush.msra.mxu2 %v979_v31  ;;  %v977_v35 = vld [vmem:[%s2196_s3 + $0xb8] sm:$0xff]  ;;  %vm315_vm1 = vcmask 261120   ;;  %s1255_s19 = smov 32  }
  0x1d   :  { %262 = vmatpush.msra.mxu0 %v241_v32  ;;  %v239_v36 = vld [vmem:[%s2196_s3 + $0x28] sm:$0xff]  ;;  %v976_v37 = vld [vmem:[%s2196_s3 + $0xb0] sm:$0xff]  ;;  %v238_v38 = vld [vmem:[%s2196_s3 + $0x20] sm:$0xff]  ;;  %s1256_s22 = smov 96   ;;  %vm406_vm2 = vcmask 523520   ;;  %vm497_vm3 = vcmask 785920  }
  0x1e   :  { %346 = vmatpush.msra.mxu2 %v978_v33  ;;  %v975_v39 = vld [vmem:[%s2196_s3 + $0xa8] sm:$0xff]  ;;  %v237_v40 = vld [vmem:[%s2196_s3 + $0x18] sm:$0xff]  ;;  %v974_v41 = vld [vmem:[%s2196_s3 + $0xa0] sm:$0xff]  ;;  %vm588_vm4 = vcmask 1048320   ;;  %s1257_s8 = smov [#allocation2]  }
  0x1f   :  { %263 = vmatpush.msra.mxu0 %v240_v34  ;;  %v236_v42 = vld [vmem:[%s2196_s3 + $0x10] sm:$0xff]  ;;  %v973_v43 = vld [vmem:[%s2196_s3 + $0x98] sm:$0xff]  ;;  %v235_v44 = vld [vmem:[%s2196_s3 + $0x8] sm:$0xff]  ;;  %s951_s9 = sshll.u32 %s1257_s8, 4  ;;  %s952_s9 = int_to_ptr.vmem [resolvable:$true] %s951_s9 }
  0x20   :  { %347 = vmatpush.msra.mxu2 %v977_v35  ;;  %v972_v45 = vld [vmem:[%s2196_s3 + $0x90] sm:$0xff]  ;;  %v234_v46 = vld [vmem:[%s2196_s3] sm:$0xff]  ;;  %v1019_v47 = vld [vmem:[%s2196_s3 + $0x178] sm:$0xff] }
  0x21   :  { %264 = vmatpush.msra.mxu0 %v239_v36  ;;  %v971_v48 = vld [vmem:[%s2196_s3 + $0x88] sm:$0xff]  ;;  %v1018_v49 = vld [vmem:[%s2196_s3 + $0x170] sm:$0xff]  ;;  %v970_v50 = vld [vmem:[%s2196_s3 + $0x80] sm:$0xff] }
  0x22   :  { %348 = vmatpush.msra.mxu2 %v976_v37  ;;  %v1053_v51 = vld [vmem:[%s2196_s3 + $0x1f8] sm:$0xff]  ;;  %v1017_v52 = vld [vmem:[%s2196_s3 + $0x168] sm:$0xff]  ;;  %v1052_v53 = vld [vmem:[%s2196_s3 + $0x1f0] sm:$0xff] }
  0x23   :  { %265 = vmatpush.msra.mxu0 %v238_v38  ;;  %v1016_v54 = vld [vmem:[%s2196_s3 + $0x160] sm:$0xff]  ;;  %v1051_v55 = vld [vmem:[%s2196_s3 + $0x1e8] sm:$0xff]  ;;  %v1015_v56 = vld [vmem:[%s2196_s3 + $0x158] sm:$0xff] }
  0x24   :  { %349 = vmatpush.msra.mxu2 %v975_v39  ;;  %v1050_v57 = vld [vmem:[%s2196_s3 + $0x1e0] sm:$0xff]  ;;  %v1014_v58 = vld [vmem:[%s2196_s3 + $0x150] sm:$0xff]  ;;  %v1049_v59 = vld [vmem:[%s2196_s3 + $0x1d8] sm:$0xff] }
  0x25   :  { %266 = vmatpush.msra.mxu0 %v237_v40  ;;  %v1013_v60 = vld [vmem:[%s2196_s3 + $0x148] sm:$0xff]  ;;  %v1048_v61 = vld [vmem:[%s2196_s3 + $0x1d0] sm:$0xff]  ;;  %v1012_v62 = vld [vmem:[%s2196_s3 + $0x140] sm:$0xff] }
  0x26   :  { %350 = vmatpush.msra.mxu2 %v974_v41  ;;  %v1047_v63 = vld [vmem:[%s2196_s3 + $0x1c8] sm:$0xff]  ;;  %v1011_v0 = vld [vmem:[%s2196_s3 + $0x138] sm:$0xff]  ;;  %v1010_v1 = vld [vmem:[%s2196_s3 + $0x130] sm:$0xff] }
  0x27   :  { %267 = vmatpush.msra.mxu0 %v236_v42  ;;  %v1009_v2 = vld [vmem:[%s2196_s3 + $0x128] sm:$0xff]  ;;  %v1008_v3 = vld [vmem:[%s2196_s3 + $0x120] sm:$0xff]  ;;  %v1007_v4 = vld [vmem:[%s2196_s3 + $0x118] sm:$0xff] }
  0x28   :  { %351 = vmatpush.msra.mxu2 %v973_v43  ;;  %v1006_v5 = vld [vmem:[%s2196_s3 + $0x110] sm:$0xff]  ;;  %v1046_v6 = vld [vmem:[%s2196_s3 + $0x1c0] sm:$0xff]  ;;  %v1005_v7 = vld [vmem:[%s2196_s3 + $0x108] sm:$0xff] }
  0x29   :  { %268 = vmatpush.msra.mxu0 %v235_v44  ;;  %v1045_v8 = vld [vmem:[%s2196_s3 + $0x1b8] sm:$0xff]  ;;  %v1004_v9 = vld [vmem:[%s2196_s3 + $0x100] sm:$0xff]  ;;  %v1044_v10 = vld [vmem:[%s2196_s3 + $0x1b0] sm:$0xff] }
  0x2a   :  { %352 = vmatpush.msra.mxu2 %v972_v45  ;;  %v1043_v11 = vld [vmem:[%s2196_s3 + $0x1a8] sm:$0xff]  ;;  %v1042_v12 = vld [vmem:[%s2196_s3 + $0x1a0] sm:$0xff]  ;;  %v1041_v13 = vld [vmem:[%s2196_s3 + $0x198] sm:$0xff] }
  0x2b   :  { %269 = vmatpush.msra.mxu0 %v234_v46  ;;  %v1040_v14 = vld [vmem:[%s2196_s3 + $0x190] sm:$0xff]  ;;  %v1039_v15 = vld [vmem:[%s2196_s3 + $0x188] sm:$0xff]  ;;  %v1038_v16 = vld [vmem:[%s2196_s3 + $0x180] sm:$0xff] }
  0x2c   :  { %353 = vmatpush.msra.mxu2 %v971_v48  ;;  %v1552_v17 = vld [vmem:[%s2195_s2] sm:$0xff]  ;;  %v1087_v25 = vld [vmem:[%s2196_s3 + $0x278] sm:$0xff]  ;;  %v1086_v28 = vld [vmem:[%s2196_s3 + $0x270] sm:$0xff] }
  0x2d   :  { %430 = vmatpush.msrb.mxu0 %v1019_v47  ;;  %v46_v18 = vperm.slane %v1552_v17, 0  ;;  %v47_v19 = vperm.slane %v1552_v17, 1  ;;  %v1121_v27 = vld [vmem:[%s2196_s3 + $0x2f8] sm:$0xff]  ;;  %v48_v29 = vperm.slane %v1552_v17, 2  ;;  %v1120_v30 = vld [vmem:[%s2196_s3 + $0x2f0] sm:$0xff]  ;;  %v1085_v31 = vld [vmem:[%s2196_s3 + $0x268] sm:$0xff] }
  0x2e   :  { %354 = vmatpush.msra.mxu2 %v970_v50  ;;  %v1119_v32 = vld [vmem:[%s2196_s3 + $0x2e8] sm:$0xff]  ;;  %v1084_v34 = vld [vmem:[%s2196_s3 + $0x260] sm:$0xff]  ;;  %v49_v36 = vperm.slane %v1552_v17, 3  ;;  %v1083_v39 = vld [vmem:[%s2196_s3 + $0x258] sm:$0xff] }
  0x2f   :  { %431 = vmatpush.msrb.mxu0 %v1018_v49  ;;  %v1118_v38 = vld [vmem:[%s2196_s3 + $0x2e0] sm:$0xff]  ;;  %v1117_v42 = vld [vmem:[%s2196_s3 + $0x2d8] sm:$0xff]  ;;  %v1082_v43 = vld [vmem:[%s2196_s3 + $0x250] sm:$0xff] }
  0x30   :  { %521 = vmatpush.msrb.mxu2 %v1053_v51  ;;  %v1116_v45 = vld [vmem:[%s2196_s3 + $0x2d0] sm:$0xff]  ;;  %v1081_v46 = vld [vmem:[%s2196_s3 + $0x248] sm:$0xff]  ;;  %v1080_v48 = vld [vmem:[%s2196_s3 + $0x240] sm:$0xff] }
  0x31   :  { %432 = vmatpush.msrb.mxu0 %v1017_v52  ;;  %v1115_v47 = vld [vmem:[%s2196_s3 + $0x2c8] sm:$0xff]  ;;  %v1114_v49 = vld [vmem:[%s2196_s3 + $0x2c0] sm:$0xff]  ;;  %v1079_v50 = vld [vmem:[%s2196_s3 + $0x238] sm:$0xff] }
  0x32   :  { %522 = vmatpush.msrb.mxu2 %v1052_v53  ;;  %v1113_v51 = vld [vmem:[%s2196_s3 + $0x2b8] sm:$0xff]  ;;  %v1078_v52 = vld [vmem:[%s2196_s3 + $0x230] sm:$0xff] }
  0x33   :  { %433 = vmatpush.msrb.mxu0 %v1016_v54  ;;  %v1112_v53 = vld [vmem:[%s2196_s3 + $0x2b0] sm:$0xff]  ;;  %v1077_v54 = vld [vmem:[%s2196_s3 + $0x228] sm:$0xff] }
  0x34   :  { %523 = vmatpush.msrb.mxu2 %v1051_v55  ;;  %v1111_v55 = vld [vmem:[%s2196_s3 + $0x2a8] sm:$0xff] }
  0x35   :  { %434 = vmatpush.msrb.mxu0 %v1015_v56  ;;  %v1076_v56 = vld [vmem:[%s2196_s3 + $0x220] sm:$0xff] }
  0x36   :  { %524 = vmatpush.msrb.mxu2 %v1050_v57  ;;  %v1110_v57 = vld [vmem:[%s2196_s3 + $0x2a0] sm:$0xff] }
  0x37   :  { %435 = vmatpush.msrb.mxu0 %v1014_v58  ;;  %v50_v58 = vperm.slane %v1552_v17, 4 }
  0x38   :  { %525 = vmatpush.msrb.mxu2 %v1049_v59  ;;  %v1075_v59 = vld [vmem:[%s2196_s3 + $0x218] sm:$0xff] }
  0x39   :  { %436 = vmatpush.msrb.mxu0 %v1013_v60  ;;  %v51_v60 = vperm.slane %v1552_v17, 5 }
  0x3a   :  { %526 = vmatpush.msrb.mxu2 %v1048_v61 }
  0x3b   :  { %437 = vmatpush.msrb.mxu0 %v1012_v62  ;;  %v1109_v62 = vld [vmem:[%s2196_s3 + $0x298] sm:$0xff] }
  0x3c   :  { %527 = vmatpush.msrb.mxu2 %v1047_v63 }
  0x3d   :  { %438 = vmatpush.msrb.mxu0 %v1011_v0  ;;  %v1074_v0 = vld [vmem:[%s2196_s3 + $0x210] sm:$0xff] }
  0x3e   :  { %528 = vmatpush.msrb.mxu2 %v1046_v6  ;;  %v1072_v6 = vld [vmem:[%s2196_s3 + $0x200] sm:$0xff] }
  0x3f   :  { %439 = vmatpush.msrb.mxu0 %v1010_v1  ;;  %v1108_v1 = vld [vmem:[%s2196_s3 + $0x290] sm:$0xff] }
  0x40   :  { %529 = vmatpush.msrb.mxu2 %v1045_v8  ;;  %v1106_v8 = vld [vmem:[%s2196_s3 + $0x280] sm:$0xff] }
  0x41   :  { %440 = vmatpush.msrb.mxu0 %v1009_v2 }
  0x42   :  { %530 = vmatpush.msrb.mxu2 %v1044_v10 }
  0x43   :  { %441 = vmatpush.msrb.mxu0 %v1008_v3  ;;  %v1073_v3 = vld [vmem:[%s2196_s3 + $0x208] sm:$0xff] }
  0x44   :  { %531 = vmatpush.msrb.mxu2 %v1043_v11  ;;  %v1189_v11 = vld [vmem:[%s2196_s3 + $0x3f8] sm:$0xff] }
  0x45   :  { %442 = vmatpush.msrb.mxu0 %v1007_v4 }
  0x46   :  { %532 = vmatpush.msrb.mxu2 %v1042_v12  ;;  %v1154_v12 = vld [vmem:[%s2196_s3 + $0x370] sm:$0xff] }
  0x47   :  { %443 = vmatpush.msrb.mxu0 %v1006_v5  ;;  %v1107_v5 = vld [vmem:[%s2196_s3 + $0x288] sm:$0xff] }
  0x48   :  { %533 = vmatpush.msrb.mxu2 %v1041_v13  ;;  %v1188_v13 = vld [vmem:[%s2196_s3 + $0x3f0] sm:$0xff] }
  0x49   :  { %444 = vmatpush.msrb.mxu0 %v1005_v7  ;;  %v1155_v7 = vld [vmem:[%s2196_s3 + $0x378] sm:$0xff] }
  0x4a   :  { %534 = vmatpush.msrb.mxu2 %v1040_v14  ;;  %v290_v14 = vld [vmem:[%s2198_s5 + $0x78] sm:$0xff] }
  0x4b   :  { %445 = vmatpush.msrb.mxu0 %v1004_v9  ;;  %295 = vmatpush.msra.mxu1 %v290_v14  ;;  %v989_v14 = vld [vmem:[%s2198_s5 + $0x90] sm:$0xff] }
  0x4c   :  { %535 = vmatpush.msrb.mxu2 %v1039_v15  ;;  %v1153_v15 = vld [vmem:[%s2196_s3 + $0x368] sm:$0xff] }
  0x4e   :  { %536 = vmatpush.msrb.mxu2 %v1038_v16  ;;  %v1187_v16 = vld [vmem:[%s2196_s3 + $0x3e8] sm:$0xff] }
  0x82   :  { %v83_v20 = vpop.f32.mrf.mxu0 }
  0x83   :  { %v84_v21 = vadd.f32 %v83_v20, %v46_v18  ;;  %v103_v22 = vpop.f32.mrf.mxu1  ;;  %v289_v18 = vld [vmem:[%s2198_s5 + $0x70] sm:$0xff]  ;;  %v1186_v20 = vld [vmem:[%s2196_s3 + $0x3e0] sm:$0xff] }
  0x84   :  { %v104_v23 = vadd.f32 %v103_v22, %v47_v19  ;;  %v1152_v19 = vld [vmem:[%s2196_s3 + $0x360] sm:$0xff]  ;;  %v1002_v22 = vld [vmem:[%s2198_s5 + $0xf8] sm:$0xff]  ;;  %296 = vmatpush.msra.mxu1 %v289_v18  ;;  %v988_v18 = vld [vmem:[%s2198_s5 + $0x88] sm:$0xff] }
  0x85   :  { %v226_v24 = vmax.f32 %v84_v21, 0.0  ;;  %v288_v21 = vld [vmem:[%s2198_s5 + $0x68] sm:$0xff]  ;;  %382 = vmatpush.msra.mxu3 %v1002_v22 }
  0x86   :  { %v227_v26 = vmax.f32 %v104_v23, 0.0  ;;  %v1151_v23 = vld [vmem:[%s2196_s3 + $0x358] sm:$0xff]  ;;  %297 = vmatpush.msra.mxu1 %v288_v21  ;;  %v1034_v22 = vld [vmem:[%s2198_s5 + $0x168] sm:$0xff] }
  0x87   :  { %270 = vmatmul.f32.vlgmr.msra.gmra.mxu0 %v226_v24  ;;  %v1001_v24 = vld [vmem:[%s2198_s5 + $0xf0] sm:$0xff]  ;;  %v1070_v21 = vld [vmem:[%s2198_s5 + $0x1f8] sm:$0xff] }
  0x88   :  { %612 = vmatpush.msra.mxu0 %v1087_v25  ;;  %355 = vmatmul.f32.vlgmr.msra.gmra.mxu2 %v227_v26  ;;  %v1185_v25 = vld [vmem:[%s2196_s3 + $0x3d8] sm:$0xff]  ;;  %v287_v26 = vld [vmem:[%s2198_s5 + $0x60] sm:$0xff] }
  0x89   :  { %698 = vmatpush.msra.mxu2 %v1121_v27  ;;  %v1150_v27 = vld [vmem:[%s2196_s3 + $0x350] sm:$0xff]  ;;  %383 = vmatpush.msra.mxu3 %v1001_v24  ;;  %v1033_v24 = vld [vmem:[%s2198_s5 + $0x160] sm:$0xff] }
  0x8a   :  { %613 = vmatpush.msra.mxu0 %v1086_v28  ;;  %v123_v33 = vpop.f32.mrf.mxu2  ;;  %v1000_v28 = vld [vmem:[%s2198_s5 + $0xe8] sm:$0xff]  ;;  %298 = vmatpush.msra.mxu1 %v287_v26  ;;  %v1032_v26 = vld [vmem:[%s2198_s5 + $0x158] sm:$0xff] }
  0x8b   :  { %699 = vmatpush.msra.mxu2 %v1120_v30  ;;  %v124_v35 = vadd.f32 %v123_v33, %v48_v29  ;;  %v143_v37 = vpop.f32.mrf.mxu3  ;;  %v163_v61 = vpop.f32.mrf.mxu0  ;;  %v1184_v29 = vld [vmem:[%s2196_s3 + $0x3d0] sm:$0xff]  ;;  %v286_v30 = vld [vmem:[%s2198_s5 + $0x58] sm:$0xff]  ;;  %v1183_v33 = vld [vmem:[%s2196_s3 + $0x3c8] sm:$0xff]  ;;  %384 = vmatpush.msra.mxu3 %v1000_v28 }
  0x8c   :  { %614 = vmatpush.msra.mxu0 %v1085_v31  ;;  %v144_v41 = vadd.f32 %v143_v37, %v49_v36  ;;  %v183_v63 = vpop.f32.mrf.mxu1  ;;  %v164_v2 = vadd.f32 %v163_v61, %v50_v58  ;;  %v1149_v31 = vld [vmem:[%s2196_s3 + $0x348] sm:$0xff]  ;;  %299 = vmatpush.msra.mxu1 %v286_v30  ;;  %v998_v36 = vld [vmem:[%s2198_s5 + $0xd8] sm:$0xff]  ;;  %v1182_v37 = vld [vmem:[%s2196_s3 + $0x3c0] sm:$0xff] }
  0x8d   :  { %700 = vmatpush.msra.mxu2 %v1119_v32  ;;  %v228_v40 = vmax.f32 %v124_v35, 0.0  ;;  %v184_v4 = vadd.f32 %v183_v63, %v51_v60  ;;  %v999_v32 = vld [vmem:[%s2198_s5 + $0xe0] sm:$0xff]  ;;  %v1143_v58 = vld [vmem:[%s2196_s3 + $0x318] sm:$0xff]  ;;  %v993_v60 = vld [vmem:[%s2198_s5 + $0xb0] sm:$0xff] }
  0x8e   :  { %615 = vmatpush.msra.mxu0 %v1084_v34  ;;  %v229_v44 = vmax.f32 %v144_v41, 0.0  ;;  %v230_v9 = vmax.f32 %v164_v2, 0.0  ;;  %v285_v34 = vld [vmem:[%s2198_s5 + $0x50] sm:$0xff]  ;;  %v1148_v35 = vld [vmem:[%s2196_s3 + $0x340] sm:$0xff]  ;;  %385 = vmatpush.msra.mxu3 %v999_v32  ;;  %v1181_v41 = vld [vmem:[%s2196_s3 + $0x3b8] sm:$0xff] }
  0x8f   :  { %701 = vmatpush.msra.mxu2 %v1118_v38  ;;  %446 = vmatmul.f32.vlgmr.msrb.gmra.mxu0 %v228_v40  ;;  %v231_v10 = vmax.f32 %v184_v4, 0.0  ;;  %v284_v38 = vld [vmem:[%s2198_s5 + $0x48] sm:$0xff]  ;;  %v997_v40 = vld [vmem:[%s2198_s5 + $0xd0] sm:$0xff]  ;;  %v279_v61 = vld [vmem:[%s2198_s5 + $0x20] sm:$0xff] }
  0x90   :  { %616 = vmatpush.msra.mxu0 %v1083_v39  ;;  %537 = vmatmul.f32.vlgmr.msrb.gmra.mxu2 %v229_v44  ;;  %v1147_v39 = vld [vmem:[%s2196_s3 + $0x338] sm:$0xff]  ;;  %v996_v44 = vld [vmem:[%s2198_s5 + $0xc8] sm:$0xff]  ;;  %v1142_v63 = vld [vmem:[%s2196_s3 + $0x310] sm:$0xff] }
  0x91   :  { %702 = vmatpush.msra.mxu2 %v1117_v42  ;;  %300 = vmatpush.msra.mxu1 %v285_v34  ;;  %v283_v42 = vld [vmem:[%s2198_s5 + $0x40] sm:$0xff]  ;;  %v1176_v2 = vld [vmem:[%s2196_s3 + $0x390] sm:$0xff]  ;;  %v1141_v4 = vld [vmem:[%s2196_s3 + $0x308] sm:$0xff] }
  0x92   :  { %617 = vmatpush.msra.mxu0 %v1082_v43  ;;  %386 = vmatpush.msra.mxu3 %v998_v36  ;;  %v1146_v43 = vld [vmem:[%s2196_s3 + $0x330] sm:$0xff]  ;;  %v1029_v30 = vld [vmem:[%s2198_s5 + $0x140] sm:$0xff] }
  0x93   :  { %703 = vmatpush.msra.mxu2 %v1116_v45  ;;  %301 = vmatpush.msra.mxu1 %v284_v38  ;;  %v1180_v45 = vld [vmem:[%s2196_s3 + $0x3b0] sm:$0xff]  ;;  %v1025_v34 = vld [vmem:[%s2198_s5 + $0x120] sm:$0xff]  ;;  %v1022_v38 = vld [vmem:[%s2198_s5 + $0x108] sm:$0xff] }
  0x94   :  { %618 = vmatpush.msra.mxu0 %v1081_v46  ;;  %v282_v46 = vld [vmem:[%s2198_s5 + $0x38] sm:$0xff]  ;;  %387 = vmatpush.msra.mxu3 %v997_v40  ;;  %v1031_v28 = vld [vmem:[%s2198_s5 + $0x150] sm:$0xff]  ;;  %v1021_v40 = vld [vmem:[%s2198_s5 + $0x100] sm:$0xff] }
  0x95   :  { %704 = vmatpush.msra.mxu2 %v1115_v47  ;;  %v1145_v47 = vld [vmem:[%s2196_s3 + $0x328] sm:$0xff]  ;;  %302 = vmatpush.msra.mxu1 %v283_v42  ;;  %v1027_v32 = vld [vmem:[%s2198_s5 + $0x130] sm:$0xff]  ;;  %v1063_v42 = vld [vmem:[%s2198_s5 + $0x1c0] sm:$0xff] }
  0x96   :  { %619 = vmatpush.msra.mxu0 %v1080_v48  ;;  %v995_v48 = vld [vmem:[%s2198_s5 + $0xc0] sm:$0xff]  ;;  %388 = vmatpush.msra.mxu3 %v996_v44  ;;  %v1023_v36 = vld [vmem:[%s2198_s5 + $0x110] sm:$0xff] }
  0x97   :  { %705 = vmatpush.msra.mxu2 %v1114_v49  ;;  %v1179_v49 = vld [vmem:[%s2196_s3 + $0x3a8] sm:$0xff]  ;;  %303 = vmatpush.msra.mxu1 %v282_v46  ;;  %v1061_v44 = vld [vmem:[%s2198_s5 + $0x1b0] sm:$0xff]  ;;  %v1059_v46 = vld [vmem:[%s2198_s5 + $0x1a0] sm:$0xff] }
  0x98   :  { %620 = vmatpush.msra.mxu0 %v1079_v50  ;;  %v281_v50 = vld [vmem:[%s2198_s5 + $0x30] sm:$0xff]  ;;  %389 = vmatpush.msra.mxu3 %v995_v48 }
  0x99   :  { %706 = vmatpush.msra.mxu2 %v1113_v51  ;;  %v1144_v51 = vld [vmem:[%s2196_s3 + $0x320] sm:$0xff]  ;;  %304 = vmatpush.msra.mxu1 %v281_v50  ;;  %v1057_v48 = vld [vmem:[%s2198_s5 + $0x190] sm:$0xff] }
  0x9a   :  { %621 = vmatpush.msra.mxu0 %v1078_v52  ;;  %v52_v52 = vperm.slane %v1552_v17, 6  ;;  %v1055_v50 = vld [vmem:[%s2198_s5 + $0x180] sm:$0xff] }
  0x9b   :  { %707 = vmatpush.msra.mxu2 %v1112_v53  ;;  %v994_v53 = vld [vmem:[%s2198_s5 + $0xb8] sm:$0xff] }
  0x9c   :  { %622 = vmatpush.msra.mxu0 %v1077_v54  ;;  %v203_v54 = vpop.f32.mrf.mxu2  ;;  %390 = vmatpush.msra.mxu3 %v994_v53 }
  0x9d   :  { %708 = vmatpush.msra.mxu2 %v1111_v55  ;;  %v1178_v55 = vld [vmem:[%s2196_s3 + $0x3a0] sm:$0xff] }
  0x9e   :  { %623 = vmatpush.msra.mxu0 %v1076_v56  ;;  %v53_v56 = vperm.slane %v1552_v17, 7  ;;  %v1177_v17 = vld [vmem:[%s2196_s3 + $0x398] sm:$0xff]  ;;  %391 = vmatpush.msra.mxu3 %v993_v60 }
  0x9f   :  { %709 = vmatpush.msra.mxu2 %v1110_v57  ;;  %v280_v57 = vld [vmem:[%s2198_s5 + $0x28] sm:$0xff] }
  0xa0   :  { %624 = vmatpush.msra.mxu0 %v1075_v59  ;;  %v223_v59 = vpop.f32.mrf.mxu3  ;;  %305 = vmatpush.msra.mxu1 %v280_v57  ;;  %v1103_v57 = vld [vmem:[%s2198_s5 + $0x270] sm:$0xff] }
  0xa1   :  { %710 = vmatpush.msra.mxu2 %v1109_v62  ;;  %v204_v62 = vadd.f32 %v203_v54, %v52_v52 }
  0xa2   :  { %625 = vmatpush.msra.mxu0 %v1074_v0  ;;  %v992_v0 = vld [vmem:[%s2198_s5 + $0xa8] sm:$0xff]  ;;  %306 = vmatpush.msra.mxu1 %v279_v61 }
  0xa3   :  { %711 = vmatpush.msra.mxu2 %v1108_v1  ;;  %v224_v1 = vadd.f32 %v223_v59, %v53_v56  ;;  %392 = vmatpush.msra.mxu3 %v992_v0  ;;  %v1213_v56 = vld [vmem:[%s2197_s4 + $0x1] ss:$0 sm:$0xff]  ;;  %v1102_v59 = vld [vmem:[%s2198_s5 + $0x268] sm:$0xff] }
  0xa4   :  { %626 = vmatpush.msra.mxu0 %v1073_v3  ;;  %v278_v3 = vld [vmem:[%s2198_s5 + $0x18] sm:$0xff] }
  0xa5   :  { %712 = vmatpush.msra.mxu2 %v1107_v5  ;;  %v991_v5 = vld [vmem:[%s2198_s5 + $0xa0] sm:$0xff]  ;;  %307 = vmatpush.msra.mxu1 %v278_v3 }
  0xa6   :  { %627 = vmatpush.msra.mxu0 %v1072_v6  ;;  %v1175_v6 = vld [vmem:[%s2196_s3 + $0x388] sm:$0xff]  ;;  %393 = vmatpush.msra.mxu3 %v991_v5  ;;  %v1099_v5 = vld [vmem:[%s2198_s5 + $0x250] sm:$0xff] }
  0xa7   :  { %713 = vmatpush.msra.mxu2 %v1106_v8  ;;  %628 = vmatmul.f32.vlgmr.msra.gmra.mxu0 %v230_v9  ;;  %v232_v8 = vmax.f32 %v204_v62, 0.0  ;;  %v1140_v9 = vld [vmem:[%s2196_s3 + $0x300] sm:$0xff] }
  0xa8   :  { %788 = vmatpush.msrb.mxu0 %v1155_v7  ;;  %714 = vmatmul.f32.vlgmr.msra.gmra.mxu2 %v231_v10  ;;  %v277_v7 = vld [vmem:[%s2198_s5 + $0x10] sm:$0xff]  ;;  %v990_v10 = vld [vmem:[%s2198_s5 + $0x98] sm:$0xff]  ;;  %v1101_v62 = vld [vmem:[%s2198_s5 + $0x260] sm:$0xff] }
  0xa9   :  { %878 = vmatpush.msrb.mxu2 %v1189_v11  ;;  %v233_v11 = vmax.f32 %v224_v1, 0.0  ;;  %308 = vmatpush.msra.mxu1 %v277_v7  ;;  %v1138_v1 = vld [vmem:[%s2198_s5 + $0x2f8] sm:$0xff]  ;;  %v1098_v7 = vld [vmem:[%s2198_s5 + $0x248] sm:$0xff] }
  0xaa   :  { %789 = vmatpush.msrb.mxu0 %v1154_v12  ;;  %v1174_v12 = vld [vmem:[%s2196_s3 + $0x380] sm:$0xff]  ;;  %394 = vmatpush.msra.mxu3 %v990_v10  ;;  %s1254_s3 = smov 64  }
  0xab   :  { %879 = vmatpush.msrb.mxu2 %v1188_v13  ;;  %v276_v13 = vld [vmem:[%s2198_s5 + $0x8] sm:$0xff]  ;;  %v1097_v10 = vld [vmem:[%s2198_s5 + $0x240] sm:$0xff] }
  0xac   :  { %790 = vmatpush.msrb.mxu0 %v1153_v15  ;;  %v275_v15 = vld [vmem:[%s2198_s5] sm:$0xff]  ;;  %309 = vmatpush.msra.mxu1 %v276_v13 }
  0xad   :  { %880 = vmatpush.msrb.mxu2 %v1187_v16  ;;  %v1036_v16 = vld [vmem:[%s2198_s5 + $0x178] sm:$0xff]  ;;  %395 = vmatpush.msra.mxu3 %v989_v14 }
  0xae   :  { %791 = vmatpush.msrb.mxu0 %v1152_v19  ;;  %310 = vmatpush.msra.mxu1 %v275_v15  ;;  %v1035_v19 = vld [vmem:[%s2198_s5 + $0x170] sm:$0xff]  ;;  %v1096_v14 = vld [vmem:[%s2198_s5 + $0x238] sm:$0xff] }
  0xaf   :  { %881 = vmatpush.msrb.mxu2 %v1186_v20  ;;  %v987_v20 = vld [vmem:[%s2198_s5 + $0x80] sm:$0xff]  ;;  %396 = vmatpush.msra.mxu3 %v988_v18  ;;  %v1133_v15 = vld [vmem:[%s2198_s5 + $0x2d0] sm:$0xff] }
  0xb0   :  { %792 = vmatpush.msrb.mxu0 %v1151_v23  ;;  %473 = vmatpush.msrb.mxu1 %v1036_v16  ;;  %v1069_v23 = vld [vmem:[%s2198_s5 + $0x1f0] sm:$0xff] }
  0xb1   :  { %882 = vmatpush.msrb.mxu2 %v1185_v25  ;;  %397 = vmatpush.msra.mxu3 %v987_v20  ;;  %v1068_v25 = vld [vmem:[%s2198_s5 + $0x1e8] sm:$0xff]  ;;  %v1095_v18 = vld [vmem:[%s2198_s5 + $0x230] sm:$0xff] }
  0xb2   :  { %793 = vmatpush.msrb.mxu0 %v1150_v27  ;;  %474 = vmatpush.msrb.mxu1 %v1035_v19  ;;  %v1067_v27 = vld [vmem:[%s2198_s5 + $0x1e0] sm:$0xff]  ;;  %v1132_v19 = vld [vmem:[%s2198_s5 + $0x2c8] sm:$0xff] }
  0xb3   :  { %883 = vmatpush.msrb.mxu2 %v1184_v29  ;;  %564 = vmatpush.msrb.mxu3 %v1070_v21  ;;  %v1030_v29 = vld [vmem:[%s2198_s5 + $0x148] sm:$0xff]  ;;  %v1131_v21 = vld [vmem:[%s2198_s5 + $0x2c0] sm:$0xff] }
  0xb4   :  { %794 = vmatpush.msrb.mxu0 %v1149_v31  ;;  %475 = vmatpush.msrb.mxu1 %v1034_v22  ;;  %v1028_v31 = vld [vmem:[%s2198_s5 + $0x138] sm:$0xff]  ;;  %v1094_v20 = vld [vmem:[%s2198_s5 + $0x228] sm:$0xff]  ;;  %v1093_v22 = vld [vmem:[%s2198_s5 + $0x220] sm:$0xff] }
  0xb5   :  { %884 = vmatpush.msrb.mxu2 %v1183_v33  ;;  %565 = vmatpush.msrb.mxu3 %v1069_v23  ;;  %v1026_v33 = vld [vmem:[%s2198_s5 + $0x128] sm:$0xff]  ;;  %v1130_v23 = vld [vmem:[%s2198_s5 + $0x2b8] sm:$0xff] }
  0xb6   :  { %795 = vmatpush.msrb.mxu0 %v1148_v35  ;;  %476 = vmatpush.msrb.mxu1 %v1033_v24  ;;  %v1024_v35 = vld [vmem:[%s2198_s5 + $0x118] sm:$0xff] }
  0xb7   :  { %885 = vmatpush.msrb.mxu2 %v1182_v37  ;;  %566 = vmatpush.msrb.mxu3 %v1068_v25  ;;  %v1066_v37 = vld [vmem:[%s2198_s5 + $0x1d8] sm:$0xff]  ;;  %v1129_v25 = vld [vmem:[%s2198_s5 + $0x2b0] sm:$0xff] }
  0xb8   :  { %796 = vmatpush.msrb.mxu0 %v1147_v39  ;;  %477 = vmatpush.msrb.mxu1 %v1032_v26  ;;  %v1065_v39 = vld [vmem:[%s2198_s5 + $0x1d0] sm:$0xff]  ;;  %v1092_v24 = vld [vmem:[%s2198_s5 + $0x218] sm:$0xff] }
  0xb9   :  { %886 = vmatpush.msrb.mxu2 %v1181_v41  ;;  %567 = vmatpush.msrb.mxu3 %v1067_v27  ;;  %v1064_v41 = vld [vmem:[%s2198_s5 + $0x1c8] sm:$0xff]  ;;  %v1091_v26 = vld [vmem:[%s2198_s5 + $0x210] sm:$0xff] }
  0xba   :  { %797 = vmatpush.msrb.mxu0 %v1146_v43  ;;  %478 = vmatpush.msrb.mxu1 %v1031_v28  ;;  %v1062_v43 = vld [vmem:[%s2198_s5 + $0x1b8] sm:$0xff]  ;;  %v1128_v27 = vld [vmem:[%s2198_s5 + $0x2a8] sm:$0xff]  ;;  %v1216_v28 = vld [vmem:[%s2197_s4 + $0x4] ss:$0 sm:$0xff] }
  0xbb   :  { %887 = vmatpush.msrb.mxu2 %v1180_v45  ;;  %568 = vmatpush.msrb.mxu3 %v1066_v37  ;;  %v1060_v45 = vld [vmem:[%s2198_s5 + $0x1a8] sm:$0xff]  ;;  %v1125_v37 = vld [vmem:[%s2198_s5 + $0x290] sm:$0xff] }
  0xbc   :  { %798 = vmatpush.msrb.mxu0 %v1145_v47  ;;  %479 = vmatpush.msrb.mxu1 %v1030_v29  ;;  %v1058_v47 = vld [vmem:[%s2198_s5 + $0x198] sm:$0xff]  ;;  %v1090_v29 = vld [vmem:[%s2198_s5 + $0x208] sm:$0xff] }
  0xbd   :  { %888 = vmatpush.msrb.mxu2 %v1179_v49  ;;  %569 = vmatpush.msrb.mxu3 %v1065_v39  ;;  %v1056_v49 = vld [vmem:[%s2198_s5 + $0x188] sm:$0xff]  ;;  %v1217_v39 = vld [vmem:[%s2197_s4 + $0x5] ss:$0 sm:$0xff] }
  0xbe   :  { %799 = vmatpush.msrb.mxu0 %v1144_v51  ;;  %480 = vmatpush.msrb.mxu1 %v1029_v30  ;;  %v1212_v51 = vld [vmem:[%s2197_s4] ss:$0 sm:$0xff] }
  0xbf   :  { %889 = vmatpush.msrb.mxu2 %v1178_v55  ;;  %570 = vmatpush.msrb.mxu3 %v1064_v41  ;;  %v1104_v55 = vld [vmem:[%s2198_s5 + $0x278] sm:$0xff]  ;;  %v1127_v30 = vld [vmem:[%s2198_s5 + $0x2a0] sm:$0xff]  ;;  %v1124_v41 = vld [vmem:[%s2198_s5 + $0x288] sm:$0xff] }
  0xc0   :  { %800 = vmatpush.msrb.mxu0 %v1143_v58  ;;  %481 = vmatpush.msrb.mxu1 %v1028_v31  ;;  %v1214_v58 = vld [vmem:[%s2197_s4 + $0x2] ss:$0 sm:$0xff] }
  0xc1   :  { %890 = vmatpush.msrb.mxu2 %v1177_v17  ;;  %571 = vmatpush.msrb.mxu3 %v1063_v42  ;;  %v1089_v31 = vld [vmem:[%s2198_s5 + $0x200] sm:$0xff] }
  0xc2   :  { %801 = vmatpush.msrb.mxu0 %v1142_v63  ;;  %482 = vmatpush.msrb.mxu1 %v1027_v32  ;;  %v1169_v42 = vld [vmem:[%s2198_s5 + $0x360] sm:$0xff] }
  0xc3   :  { %891 = vmatpush.msrb.mxu2 %v1176_v2  ;;  %572 = vmatpush.msrb.mxu3 %v1062_v43  ;;  %v1100_v2 = vld [vmem:[%s2198_s5 + $0x258] sm:$0xff]  ;;  %v1123_v43 = vld [vmem:[%s2198_s5 + $0x280] sm:$0xff] }
  0xc4   :  { %802 = vmatpush.msrb.mxu0 %v1141_v4  ;;  %483 = vmatpush.msrb.mxu1 %v1026_v33  ;;  %v1137_v4 = vld [vmem:[%s2198_s5 + $0x2f0] sm:$0xff]  ;;  %v1172_v33 = vld [vmem:[%s2198_s5 + $0x378] sm:$0xff] }
  0xc5   :  { %892 = vmatpush.msrb.mxu2 %v1175_v6  ;;  %573 = vmatpush.msrb.mxu3 %v1061_v44  ;;  %v1136_v6 = vld [vmem:[%s2198_s5 + $0x2e8] sm:$0xff] }
  0xc6   :  { %803 = vmatpush.msrb.mxu0 %v1140_v9  ;;  %484 = vmatpush.msrb.mxu1 %v1025_v34  ;;  %v1135_v9 = vld [vmem:[%s2198_s5 + $0x2e0] sm:$0xff]  ;;  %v1126_v34 = vld [vmem:[%s2198_s5 + $0x298] sm:$0xff] }
  0xc7   :  { %804 = vmatmul.f32.vlgmr.msrb.gmra.mxu0 %v232_v8  ;;  %893 = vmatpush.msrb.mxu2 %v1174_v12  ;;  %v1215_v8 = vld [vmem:[%s2197_s4 + $0x3] ss:$0 sm:$0xff]  ;;  %v1134_v12 = vld [vmem:[%s2198_s5 + $0x2d8] sm:$0xff] }
  0xc8   :  { %894 = vmatmul.f32.vlgmr.msrb.gmra.mxu2 %v233_v11  ;;  %485 = vmatpush.msrb.mxu1 %v1024_v35 }
  0xc9   :  { %574 = vmatpush.msrb.mxu3 %v1060_v45 }
  0xca   :  { %486 = vmatpush.msrb.mxu1 %v1023_v36  ;;  %v1171_v36 = vld [vmem:[%s2198_s5 + $0x370] sm:$0xff] }
  0xcb   :  { %575 = vmatpush.msrb.mxu3 %v1059_v46  ;;  %v1206_v46 = vld [vmem:[%s2198_s5 + $0x3f8] sm:$0xff] }
  0xcc   :  { %487 = vmatpush.msrb.mxu1 %v1022_v38 }
  0xcd   :  { %576 = vmatpush.msrb.mxu3 %v1058_v47  ;;  %v1168_v47 = vld [vmem:[%s2198_s5 + $0x358] sm:$0xff] }
  0xce   :  { %488 = vmatpush.msrb.mxu1 %v1021_v40  ;;  %v1170_v40 = vld [vmem:[%s2198_s5 + $0x368] sm:$0xff] }
  0xcf   :  { %577 = vmatpush.msrb.mxu3 %v1057_v48 }
  0xd1   :  { %578 = vmatpush.msrb.mxu3 %v1056_v49  ;;  %v1205_v49 = vld [vmem:[%s2198_s5 + $0x3f0] sm:$0xff] }
  0xd3   :  { %579 = vmatpush.msrb.mxu3 %v1055_v50  ;;  %v1167_v50 = vld [vmem:[%s2198_s5 + $0x350] sm:$0xff] }
 0x104   :  { %v271_v52 = vpop.f32.mrf.mxu0 }
 0x105   :  { %v272_v53 = vadd.f32 %v1212_v51, %v271_v52  ;;  %v1204_v51 = vld [vmem:[%s2198_s5 + $0x3e8] sm:$0xff] }
 0x106   :  { %v1166_v52 = vld [vmem:[%s2198_s5 + $0x348] sm:$0xff] }
 0x107   :  { %v274_v54 = vmax.f32 %v272_v53, 0.0  ;;  %v1203_v53 = vld [vmem:[%s2198_s5 + $0x3e0] sm:$0xff] }
 0x109   :  { %311 = vmatmul.f32.vlgmr.msra.gmra.mxu1 %v274_v54  ;;  %v1165_v54 = vld [vmem:[%s2198_s5 + $0x340] sm:$0xff] }
 0x10a   :  { %655 = vmatpush.msra.mxu1 %v1104_v55  ;;  %v1202_v55 = vld [vmem:[%s2198_s5 + $0x3d8] sm:$0xff] }
 0x10b   :  { %v356_v60 = vpop.f32.mrf.mxu2 }
 0x10c   :  { %656 = vmatpush.msra.mxu1 %v1103_v57  ;;  %v357_v17 = vadd.f32 %v1213_v56, %v356_v60  ;;  %v447_v61 = vpop.f32.mrf.mxu0  ;;  %v1164_v56 = vld [vmem:[%s2198_s5 + $0x338] sm:$0xff]  ;;  %v1201_v57 = vld [vmem:[%s2198_s5 + $0x3d0] sm:$0xff]  ;;  %v1162_v60 = vld [vmem:[%s2198_s5 + $0x328] sm:$0xff] }
 0x10d   :  { %v448_v63 = vadd.f32 %v1214_v58, %v447_v61  ;;  %v1163_v58 = vld [vmem:[%s2198_s5 + $0x330] sm:$0xff]  ;;  %v1161_v61 = vld [vmem:[%s2198_s5 + $0x320] sm:$0xff] }
 0x10e   :  { %657 = vmatpush.msra.mxu1 %v1102_v59  ;;  %v359_v0 = vmax.f32 %v357_v17, 0.0  ;;  %v1200_v59 = vld [vmem:[%s2198_s5 + $0x3c8] sm:$0xff]  ;;  %v1199_v17 = vld [vmem:[%s2198_s5 + $0x3c0] sm:$0xff] }
 0x10f   :  { %v450_v3 = vmax.f32 %v448_v63, 0.0  ;;  %v1160_v63 = vld [vmem:[%s2198_s5 + $0x318] sm:$0xff] }
 0x110   :  { %658 = vmatpush.msra.mxu1 %v1101_v62  ;;  %398 = vmatmul.f32.vlgmr.msra.gmra.mxu3 %v359_v0  ;;  %v1198_v62 = vld [vmem:[%s2198_s5 + $0x3b8] sm:$0xff]  ;;  %v1197_v0 = vld [vmem:[%s2198_s5 + $0x3b0] sm:$0xff] }
 0x111   :  { %741 = vmatpush.msra.mxu3 %v1138_v1  ;;  %489 = vmatmul.f32.vlgmr.msrb.gmra.mxu1 %v450_v3  ;;  %v1218_v1 = vld [vmem:[%s2197_s4 + $0x6] ss:$0 sm:$0xff]  ;;  %v1196_v3 = vld [vmem:[%s2198_s5 + $0x3a8] sm:$0xff] }
 0x112   :  { %659 = vmatpush.msra.mxu1 %v1100_v2  ;;  %v1159_v2 = vld [vmem:[%s2198_s5 + $0x310] sm:$0xff] }
 0x113   :  { %742 = vmatpush.msra.mxu3 %v1137_v4  ;;  %v538_v11 = vpop.f32.mrf.mxu2  ;;  %v1158_v4 = vld [vmem:[%s2198_s5 + $0x308] sm:$0xff] }
 0x114   :  { %660 = vmatpush.msra.mxu1 %v1099_v5  ;;  %v539_v13 = vadd.f32 %v1215_v8, %v538_v11  ;;  %v1157_v8 = vld [vmem:[%s2198_s5 + $0x300] sm:$0xff] }
 0x115   :  { %743 = vmatpush.msra.mxu3 %v1136_v6  ;;  %v1195_v6 = vld [vmem:[%s2198_s5 + $0x3a0] sm:$0xff] }
 0x116   :  { %661 = vmatpush.msra.mxu1 %v1098_v7  ;;  %v541_v16 = vmax.f32 %v539_v13, 0.0  ;;  %v1219_v11 = vld [vmem:[%s2197_s4 + $0x7] ss:$0 sm:$0xff]  ;;  %v1192_v13 = vld [vmem:[%s2198_s5 + $0x388] sm:$0xff] }
 0x117   :  { %744 = vmatpush.msra.mxu3 %v1135_v9  ;;  %v1194_v9 = vld [vmem:[%s2198_s5 + $0x398] sm:$0xff] }
 0x118   :  { %662 = vmatpush.msra.mxu1 %v1097_v10  ;;  %580 = vmatmul.f32.vlgmr.msrb.gmra.mxu3 %v541_v16  ;;  %v1191_v16 = vld [vmem:[%s2198_s5 + $0x380] sm:$0xff] }
 0x119   :  { %745 = vmatpush.msra.mxu3 %v1134_v12  ;;  %v1193_v12 = vld [vmem:[%s2198_s5 + $0x390] sm:$0xff] }
 0x11a   :  { %663 = vmatpush.msra.mxu1 %v1096_v14 }
 0x11b   :  { %746 = vmatpush.msra.mxu3 %v1133_v15 }
 0x11c   :  { %664 = vmatpush.msra.mxu1 %v1095_v18 }
 0x11d   :  { %747 = vmatpush.msra.mxu3 %v1132_v19  ;;  %v1220_v19 = vld [vmem:[%s2199_s6] ss:$0 sm:$0xff] }
 0x11e   :  { %665 = vmatpush.msra.mxu1 %v1094_v20 }
 0x11f   :  { %748 = vmatpush.msra.mxu3 %v1131_v21 }
 0x120   :  { %666 = vmatpush.msra.mxu1 %v1093_v22  ;;  %v1222_v22 = vld [vmem:[%s2199_s6 + $0x2] ss:$0 sm:$0xff] }
 0x121   :  { %749 = vmatpush.msra.mxu3 %v1130_v23 }
 0x122   :  { %667 = vmatpush.msra.mxu1 %v1092_v24 }
 0x123   :  { %750 = vmatpush.msra.mxu3 %v1129_v25  ;;  %v1221_v25 = vld [vmem:[%s2199_s6 + $0x1] ss:$0 sm:$0xff] }
 0x124   :  { %668 = vmatpush.msra.mxu1 %v1091_v26  ;;  %v629_v32 = vpop.f32.mrf.mxu0 }
 0x125   :  { %751 = vmatpush.msra.mxu3 %v1128_v27  ;;  %v630_v35 = vadd.f32 %v1216_v28, %v629_v32  ;;  %v1223_v28 = vld [vmem:[%s2199_s6 + $0x3] ss:$0 sm:$0xff] }
 0x126   :  { %669 = vmatpush.msra.mxu1 %v1090_v29 }
 0x127   :  { %752 = vmatpush.msra.mxu3 %v1127_v30  ;;  %v632_v38 = vmax.f32 %v630_v35, 0.0 }
 0x128   :  { %670 = vmatpush.msra.mxu1 %v1089_v31  ;;  %v1224_v31 = vld [vmem:[%s2199_s6 + $0x4] ss:$0 sm:$0xff] }
 0x129   :  { %753 = vmatpush.msra.mxu3 %v1126_v34  ;;  %671 = vmatmul.f32.vlgmr.msra.gmra.mxu1 %v632_v38  ;;  %v1225_v34 = vld [vmem:[%s2199_s6 + $0x5] ss:$0 sm:$0xff] }
 0x12a   :  { %831 = vmatpush.msrb.mxu1 %v1172_v33 }
 0x12b   :  { %754 = vmatpush.msra.mxu3 %v1125_v37  ;;  %v715_v44 = vpop.f32.mrf.mxu2  ;;  %v1226_v37 = vld [vmem:[%s2199_s6 + $0x6] ss:$0 sm:$0xff] }
 0x12c   :  { %832 = vmatpush.msrb.mxu1 %v1171_v36  ;;  %v716_v45 = vadd.f32 %v1217_v39, %v715_v44 }
 0x12d   :  { %755 = vmatpush.msra.mxu3 %v1124_v41 }
 0x12e   :  { %833 = vmatpush.msrb.mxu1 %v1170_v40  ;;  %v718_v48 = vmax.f32 %v716_v45, 0.0  ;;  %v1227_v40 = vld [vmem:[%s2199_s6 + $0x7] ss:$0 sm:$0xff]  ;;  %s953_s6 = sshll.u32 %s2200_s7, 4  ;;  %s954_s6 = int_to_ptr.hbm [resolvable:$true] %s953_s6 }
 0x12f   :  { %756 = vmatpush.msra.mxu3 %v1123_v43 }
 0x130   :  { %834 = vmatpush.msrb.mxu1 %v1169_v42  ;;  %757 = vmatmul.f32.vlgmr.msra.gmra.mxu3 %v718_v48 }
 0x131   :  { %921 = vmatpush.msrb.mxu3 %v1206_v46 }
 0x132   :  { %835 = vmatpush.msrb.mxu1 %v1168_v47 }
 0x133   :  { %922 = vmatpush.msrb.mxu3 %v1205_v49 }
 0x134   :  { %836 = vmatpush.msrb.mxu1 %v1167_v50 }
 0x135   :  { %923 = vmatpush.msrb.mxu3 %v1204_v51 }
 0x136   :  { %837 = vmatpush.msrb.mxu1 %v1166_v52 }
 0x137   :  { %924 = vmatpush.msrb.mxu3 %v1203_v53 }
 0x138   :  { %838 = vmatpush.msrb.mxu1 %v1165_v54 }
 0x139   :  { %925 = vmatpush.msrb.mxu3 %v1202_v55 }
 0x13a   :  { %839 = vmatpush.msrb.mxu1 %v1164_v56 }
 0x13b   :  { %926 = vmatpush.msrb.mxu3 %v1201_v57 }
 0x13c   :  { %840 = vmatpush.msrb.mxu1 %v1163_v58 }
 0x13d   :  { %927 = vmatpush.msrb.mxu3 %v1200_v59 }
 0x13e   :  { %841 = vmatpush.msrb.mxu1 %v1162_v60 }
 0x13f   :  { %928 = vmatpush.msrb.mxu3 %v1199_v17 }
 0x140   :  { %842 = vmatpush.msrb.mxu1 %v1161_v61 }
 0x141   :  { %929 = vmatpush.msrb.mxu3 %v1198_v62 }
 0x142   :  { %843 = vmatpush.msrb.mxu1 %v1160_v63 }
 0x143   :  { %930 = vmatpush.msrb.mxu3 %v1197_v0 }
 0x144   :  { %v805_v5 = vpop.f32.mrf.mxu0  ;;  %844 = vmatpush.msrb.mxu1 %v1159_v2 }
 0x145   :  { %v806_v7 = vadd.f32 %v1218_v1, %v805_v5  ;;  %931 = vmatpush.msrb.mxu3 %v1196_v3 }
 0x146   :  { %845 = vmatpush.msrb.mxu1 %v1158_v4 }
 0x147   :  { %v808_v10 = vmax.f32 %v806_v7, 0.0  ;;  %932 = vmatpush.msrb.mxu3 %v1195_v6 }
 0x148   :  { %846 = vmatpush.msrb.mxu1 %v1157_v8 }
 0x149   :  { %847 = vmatmul.f32.vlgmr.msrb.gmra.mxu1 %v808_v10  ;;  %933 = vmatpush.msrb.mxu3 %v1194_v9 }
 0x14b   :  { %v895_v14 = vpop.f32.mrf.mxu2  ;;  %934 = vmatpush.msrb.mxu3 %v1193_v12 }
 0x14c   :  { %v896_v15 = vadd.f32 %v1219_v11, %v895_v14 }
 0x14d   :  { %935 = vmatpush.msrb.mxu3 %v1192_v13 }
 0x14e   :  { %v898_v18 = vmax.f32 %v896_v15, 0.0 }
 0x14f   :  { %936 = vmatpush.msrb.mxu3 %v1191_v16 }
 0x150   :  { %937 = vmatmul.f32.vlgmr.msrb.gmra.mxu3 %v898_v18 }
 0x186   :  { %v312_v20 = vpop.f32.mrf.mxu1 }
 0x187   :  { %v313_v21 = vadd.f32 %v1220_v19, %v312_v20 }
 0x189   :  { %316 = vst.msk [vmem:[#allocation2] sm:$0xff] %vm315_vm1, %v313_v21 }
 0x18e   :  { %v490_v23 = vpop.f32.mrf.mxu1 }
 0x18f   :  { %v491_v24 = vadd.f32 %v1222_v22, %v490_v23 }
 0x191   :  { %494 = vrot.lane.b32.xlu1 %v491_v24, %s1254_s3 }
 0x193   :  { %v399_v26 = vpop.f32.mrf.mxu3 }
 0x194   :  { %v400_v27 = vadd.f32 %v1221_v25, %v399_v26 }
 0x196   :  { %403 = vrot.lane.b32.xlu0 %v400_v27, %s1255_s19 }
 0x19b   :  { %v581_v29 = vpop.f32.mrf.mxu3 }
 0x19c   :  { %v582_v30 = vadd.f32 %v1223_v28, %v581_v29 }
 0x19e   :  { %585 = vrot.lane.b32.xlu2 %v582_v30, %s1256_s22 }
 0x1a6   :  { %v672_v32 = vpop.f32.mrf.mxu1 }
 0x1a7   :  { %v673_v33 = vadd.f32 %v1224_v31, %v672_v32 }
 0x1a9   :  { %675 = vst.msk [vmem:[#allocation2 + $0x8] sm:$0xff] %vm315_vm1, %v673_v33 }
 0x1b3   :  { %v758_v35 = vpop.f32.mrf.mxu3 }
 0x1b4   :  { %v759_v36 = vadd.f32 %v1225_v34, %v758_v35 }
 0x1b6   :  { %762 = vrot.lane.b32.xlu0 %v759_v36, %s1255_s19 }
 0x1c6   :  { %v848_v38 = vpop.f32.mrf.mxu1 }
 0x1c7   :  { %v849_v39 = vadd.f32 %v1226_v37, %v848_v38 }
 0x1c9   :  { %852 = vrot.lane.b32.xlu1 %v849_v39, %s1254_s3 }
 0x1d3   :  { %v938_v41 = vpop.f32.mrf.mxu3 }
 0x1d4   :  { %v939_v42 = vadd.f32 %v1227_v40, %v938_v41 }
 0x1d6   :  { %942 = vrot.lane.b32.xlu2 %v939_v42, %s1256_s22 }
 0x1f8   :  { %v586_v45 = vpop.permute.xlu2 %585 }
 0x203   :  { %v495_v43 = vpop.permute.xlu1 %494 }
 0x208   :  { %v404_v44 = vpop.permute.xlu0 %403 }
 0x209   :  { %407 = vst.msk [vmem:[#allocation2] sm:$0xff] %vm406_vm2, %v404_v44 }
 0x20a   :  { %498 = vst.msk [vmem:[#allocation2] sm:$0xff] %vm497_vm3, %v495_v43 }
 0x20b   :  { %589 = vst.msk [vmem:[#allocation2] sm:$0xff] %vm588_vm4, %v586_v45 }
 0x228   :  { %v763_v46 = vpop.permute.xlu0 %762 }
 0x229   :  { %765 = vst.msk [vmem:[#allocation2 + $0x8] sm:$0xff] %vm406_vm2, %v763_v46 }
 0x230   :  { %v943_v47 = vpop.permute.xlu2 %942 }
 0x23b   :  { %v853_v48 = vpop.permute.xlu1 %852 }
 0x23c   :  { %855 = vst.msk [vmem:[#allocation2 + $0x8] sm:$0xff] %vm497_vm3, %v853_v48 }
 0x23d   :  { %945 = vst.msk [vmem:[#allocation2 + $0x8] sm:$0xff] %vm588_vm4, %v943_v47 }
 0x23e   :  { %956 = dma.vmem_to_hbm [thread:$0]  %s952_s9, 256, %s954_s6, [#allocation3]  }
 0x23f   :  { %1252 = dma.done.wait [#allocation3], 256  }
 0x240   :  { %1253 = vsyncadd [#allocation3], 4294967040 }
 0x241   :  { %961 = vsyncpa [#allocation3], 1 }

</bundles_post_ra>
